<compile_context>
chip_gen: v7x
topology: tpu7x:2x2x1
jax: 0.10.0
libtpu: 0.0.40
codegen_flags: <defaults>
</compile_context>

<pallas_src>
import jax
import jax.numpy as jnp
from jax.experimental import pallas as pl
from jax.experimental.pallas import tpu as pltpu


def _round_up(x, m):
    return ((x + m - 1) // m) * m


# --------------------------------------------------------------------------
# Pass 1: in-kernel conv (kh*kw shifted matmuls) + per-image channel stats.
# --------------------------------------------------------------------------
def _make_conv_stats_kernel(kh, kw, wp, tm):
    win = tm + kw - 1  # row window per vertical tap (covers all kw shifts)

    def kernel(x_ref, w_ref, mask_ref, conv_ref, sum_ref, sq_ref):
        # x_ref:    [1, L, Cin]        flattened padded image (resident per n)
        # w_ref:    [kh*kw, Cin, Cpad] tap weights (resident)
        # mask_ref: [tm, 1]            1.0 for valid virtual rows, else 0.0
        # conv_ref: [1, tm, Cpad]      conv output tile (compute dtype)
        # sum_ref / sq_ref: [1, 1, Cpad] per-image f32 accumulators
        hb = pl.program_id(1)

        @pl.when(hb == 0)
        def _init():
            sum_ref[...] = jnp.zeros_like(sum_ref)
            sq_ref[...] = jnp.zeros_like(sq_ref)

        base = hb * tm
        acc = None
        for i in range(kh):
            # Aligned dynamic start (tm is a multiple of 16, wp of 8).
            start = pl.multiple_of(base + i * wp, 8)
            window = x_ref[0, pl.ds(start, win), :]          # [win, Cin]
            for j in range(kw):
                patch = window[j:j + tm, :]                  # static slice [tm, Cin]
                contrib = jnp.dot(patch, w_ref[i * kw + j],
                                  preferred_element_type=jnp.float32)
                acc = contrib if acc is None else acc + contrib

        # bf16 intermediate store; stats taken from the f32 accumulator.
        conv_ref[0] = acc.astype(conv_ref.dtype)

        valid = mask_ref[...]                                # [tm, 1] in {0,1}
        macc = acc * valid
        sum_ref[...] += jnp.sum(macc, axis=0, keepdims=True)[None]
        sq_ref[...] += jnp.sum(macc * macc, axis=0, keepdims=True)[None]

    return kernel


# --------------------------------------------------------------------------
# Pass 2: y = relu(conv * scale + shift), emitted directly in output dtype.
# --------------------------------------------------------------------------
def _bn_relu_kernel(conv_ref, scale_ref, shift_ref, o_ref):
    y = conv_ref[0].astype(jnp.float32) * scale_ref[...] + shift_ref[...]
    o_ref[0] = jnp.maximum(y, 0.0).astype(o_ref.dtype)


def conv_block_forward(x_nchw, weight, bias, gamma, beta, *,
                       padding=1, stride=1, eps=1e-5,
                       tile_m=512,                     # rows of the virtual output grid per step
                       compute_dtype=jnp.bfloat16,     # bf16 MXU inputs + bf16 intermediate
                       vmem_limit_bytes=48 * 1024 * 1024):
    """x_nchw: [N, Cin, H, W]; weight: [Cout, Cin, kh, kw] (PyTorch layout)."""
    del bias  # exactly cancelled by the batch-statistics mean subtraction
    # TODO(synk): support stride > 1 (strided pl.ds on the flattened rows);
    # dilation/groups are likewise not implemented in-kernel.
    assert stride == 1, "in-kernel conv currently implements stride=1 only"

    N, Cin, H, W = x_nchw.shape
    Cout, wcin, kh, kw = weight.shape
    assert wcin == Cin
    Ho = H + 2 * padding - kh + 1
    Wo = W + 2 * padding - kw + 1
    Hp = H + 2 * padding
    Wp = _round_up(W + 2 * padding, 8)     # width padded to 8 -> aligned row shifts

    # ---- glue: NCHW -> padded NHWC -> row-flattened per image ---------------
    # (one relayout pass over ~input-sized bytes; no 9x im2col expansion)
    x_nhwc = jnp.transpose(x_nchw, (0, 2, 3, 1))
    xpad = jnp.pad(x_nhwc, ((0, 0), (padding, padding),
                            (padding, Wp - W - padding), (0, 0)))

    # Virtual output grid: width Wp (columns >= Wo and rows >= Ho are dead).
    Mv = Ho * Wp
    tm = min(_round_up(tile_m, 16), _round_up(Mv, 16))   # 16-mult (bf16 sublane packing)
    Mv_pad = _round_up(Mv, tm)
    HB = Mv_pad // tm
    L = Mv_pad + (kh - 1) * Wp + (kw - 1)                # exact in-kernel read extent

    xflat = xpad.reshape(N, Hp * Wp, Cin).astype(compute_dtype)
    xflat = jnp.pad(xflat, ((0, 0), (0, L - Hp * Wp), (0, 0)))

    # Lane-dense output channels; contraction dim Cin left unpadded.
    Cpad = _round_up(max(Cout, 128), 128)
    w_taps = jnp.transpose(weight, (2, 3, 1, 0)).reshape(kh * kw, Cin, Cout)
    w_p = jnp.zeros((kh * kw, Cin, Cpad), compute_dtype).at[:, :, :Cout].set(
        w_taps.astype(compute_dtype))

    # Per-virtual-row validity mask (shared across images), built once in XLA.
    mo = jnp.arange(Mv_pad, dtype=jnp.int32)
    valid = ((mo % Wp) < Wo) & (mo < Mv)
    mask = valid.astype(jnp.float32)[:, None]            # [Mv_pad, 1]

    # ---- pass 1: conv + per-image stats -------------------------------------
    conv_out, csum, csq = pl.pallas_call(
        _make_conv_stats_kernel(kh, kw, Wp, tm),
        out_shape=(jax.ShapeDtypeStruct((N, Mv_pad, Cpad), compute_dtype),
                   jax.ShapeDtypeStruct((N, 1, Cpad), jnp.float32),
                   jax.ShapeDtypeStruct((N, 1, Cpad), jnp.float32)),
        grid_spec=pltpu.PrefetchScalarGridSpec(
            num_scalar_prefetch=0,
            grid=(N, HB),
            in_specs=[pl.BlockSpec((1, L, Cin), lambda n, hb: (n, 0, 0)),       # image resident per n
                      pl.BlockSpec((kh * kw, Cin, Cpad), lambda n, hb: (0, 0, 0)),  # weights resident
                      pl.BlockSpec((tm, 1), lambda n, hb: (hb, 0))],            # row-validity mask
            out_specs=(pl.BlockSpec((1, tm, Cpad), lambda n, hb: (n, hb, 0)),
                       pl.BlockSpec((1, 1, Cpad), lambda n, hb: (n, 0, 0)),
                       pl.BlockSpec((1, 1, Cpad), lambda n, hb: (n, 0, 0)))),
        compiler_params=pltpu.CompilerParams(
            dimension_semantics=("parallel", "arbitrary"),   # batch axis megacore-shardable
            vmem_limit_bytes=vmem_limit_bytes),
    )(xflat, w_p, mask)

    # ---- finalize BN stats on tiny [1, Cpad] arrays --------------------------
    # Per-image partials reduced here (also mitigates long running-sum drift).
    m_true = jnp.float32(N * Ho * Wo)
    mean = jnp.sum(csum, axis=0) / m_true                 # [1, Cpad]
    var = jnp.sum(csq, axis=0) / m_true - mean * mean
    inv_std = jax.lax.rsqrt(var + eps)
    gamma_p = jnp.zeros((1, Cpad), jnp.float32).at[0, :Cout].set(gamma.astype(jnp.float32))
    beta_p = jnp.zeros((1, Cpad), jnp.float32).at[0, :Cout].set(beta.astype(jnp.float32))
    scale = gamma_p * inv_std                  # padded channels -> scale 0 -> output 0
    shift = beta_p - mean * scale

    # ---- pass 2: normalize + ReLU, emitted directly in x.dtype ---------------
    out_dtype = x_nchw.dtype
    y = pl.pallas_call(
        _bn_relu_kernel,
        out_shape=jax.ShapeDtypeStruct((N, Mv_pad, Cpad), out_dtype),
        grid_spec=pltpu.PrefetchScalarGridSpec(
            num_scalar_prefetch=0,
            grid=(N, HB),
            in_specs=[pl.BlockSpec((1, tm, Cpad), lambda n, hb: (n, hb, 0)),
                      pl.BlockSpec((1, Cpad), lambda n, hb: (0, 0)),
                      pl.BlockSpec((1, Cpad), lambda n, hb: (0, 0))],
            out_specs=pl.BlockSpec((1, tm, Cpad), lambda n, hb: (n, hb, 0))),
        compiler_params=pltpu.CompilerParams(
            dimension_semantics=("parallel", "parallel"),
            vmem_limit_bytes=vmem_limit_bytes),
    )(conv_out, scale, shift)

    # Drop dead virtual columns / padded rows, back to NCHW for module parity.
    # TODO(synk): callers that consume NHWC can skip this final transpose.
    out = y[:, :Mv, :Cout].reshape(N, Ho, Wp, Cout)[:, :, :Wo, :]
    return jnp.transpose(out, (0, 3, 1, 2))


def _reference(x, weight, bias, gamma, beta, padding=1, stride=1):
    conv = jax.lax.conv_general_dilated(
        x, weight, window_strides=(stride, stride),
        padding=[(padding, padding), (padding, padding)],
        dimension_numbers=("NCHW", "OIHW", "NCHW")) + bias[None, :, None, None]
    mean = conv.mean(axis=(0, 2, 3), keepdims=True)
    var = ((conv - mean) ** 2).mean(axis=(0, 2, 3), keepdims=True)
    y = (conv - mean) * jax.lax.rsqrt(var + 1e-5)
    y = y * gamma[None, :, None, None] + beta[None, :, None, None]
    return jnp.maximum(y, 0.0)


if __name__ == "__main__":
    key = jax.random.PRNGKey(0)
    k1, k2, k3 = jax.random.split(key, 3)

    N, Cin, H, W = 2, 4, 16, 16
    Cout, kh, kw = 8, 3, 3
    padding, stride = 1, 1

    x = jax.random.normal(k1, (N, Cin, H, W), dtype=jnp.float32)
    # shapes follow nn.Conv2d / nn.BatchNorm2d defaults
    weight = 0.1 * jax.random.normal(k2, (Cout, Cin, kh, kw), dtype=jnp.float32)
    bias = 0.05 * jax.random.normal(k3, (Cout,), dtype=jnp.float32)
    gamma = jnp.ones((Cout,), dtype=jnp.float32)    # BatchNorm default init
    beta = jnp.zeros((Cout,), dtype=jnp.float32)

    ref = _reference(x, weight, bias, gamma, beta, padding=padding, stride=stride)

    # Exact-semantics path (f32 everywhere); small tile -> exercises the
    # multi-step per-image stats accumulation (HB > 1) and row masking.
    out_f32 = conv_block_forward(x, weight, bias, gamma, beta,
                                 padding=padding, stride=stride,
                                 compute_dtype=jnp.float32, tile_m=128)
    out_f32 = jax.block_until_ready(out_f32)
    assert out_f32.shape == (N, Cout, H, W)
    assert jnp.allclose(out_f32, ref, atol=1e-4, rtol=1e-4), "f32 path mismatch"

    # Default path: bf16 MXU inputs + bf16 conv intermediate, f32 stats/epilogue.
    out_bf16 = conv_block_forward(x, weight, bias, gamma, beta,
                                  padding=padding, stride=stride)
    out_bf16 = jax.block_until_ready(out_bf16)
    assert out_bf16.shape == (N, Cout, H, W)
    assert jnp.allclose(out_bf16, ref, atol=5e-2, rtol=5e-2), "bf16 path mismatch"

    print("KERNEL_OK")
</pallas_src>

<mosaic_0001>
module attributes {stable_mosaic.version = 11 : i64} {
  func.func @kernel(%arg0: i32, %arg1: i32, %arg2: memref<1x434x4xf32, #tpu.memory_space<vmem>>, %arg3: memref<9x4x128xf32, #tpu.memory_space<vmem>>, %arg4: memref<128x1xf32, #tpu.memory_space<vmem>>, %arg5: memref<1x128x128xf32, #tpu.memory_space<vmem>>, %arg6: memref<1x1x128xf32, #tpu.memory_space<vmem>>, %arg7: memref<1x1x128xf32, #tpu.memory_space<vmem>>) attributes {dimension_semantics = [#tpu.dimension_semantics<parallel>, #tpu.dimension_semantics<arbitrary>], iteration_bounds = array<i64: 2, 3>, scalar_prefetch = 0 : i64, scratch_operands = 0 : i64, tpu.core_type = #tpu.core_type<tc>, window_params = [{transform_indices = @transform_0, window_bounds = array<i64: 1, 434, 4>}, {pipeline_mode = #tpu.pipeline_mode<synchronous>, transform_indices = @transform_1, window_bounds = array<i64: 9, 4, 128>}, {transform_indices = @transform_2, window_bounds = array<i64: 128, 1>}, {transform_indices = @transform_3, window_bounds = array<i64: 1, 128, 128>}, {transform_indices = @transform_4, window_bounds = array<i64: 1, 1, 128>}, {transform_indices = @transform_5, window_bounds = array<i64: 1, 1, 128>}]} {
    %c0_i32 = arith.constant 0 : i32
    %0 = arith.cmpi eq, %arg1, %c0_i32 : i32
    %1 = arith.extui %0 : i1 to i32
    %c0_i32_0 = arith.constant 0 : i32
    %2 = arith.cmpi ne, %1, %c0_i32_0 : i32
    scf.if %2 {
      %cst_53 = arith.constant 0.000000e+00 : f32
      %82 = vector.broadcast %cst_53 : f32 to vector<1x1x128xf32>
      %c0_54 = arith.constant 0 : index
      %c0_55 = arith.constant 0 : index
      %c0_56 = arith.constant 0 : index
      %83 = vector.load %arg6[%c0_54, %c0_55, %c0_56] : memref<1x1x128xf32, #tpu.memory_space<vmem>>, vector<1x1x128xf32>
      tpu.vector_store %arg6[%c0_54, %c0_55, %c0_56], %82 {strides = array<i32>} : memref<1x1x128xf32, #tpu.memory_space<vmem>>, vector<1x1x128xf32>,
      %cst_57 = arith.constant 0.000000e+00 : f32
      %84 = vector.broadcast %cst_57 : f32 to vector<1x1x128xf32>
      %c0_58 = arith.constant 0 : index
      %c0_59 = arith.constant 0 : index
      %c0_60 = arith.constant 0 : index
      %85 = vector.load %arg7[%c0_58, %c0_59, %c0_60] : memref<1x1x128xf32, #tpu.memory_space<vmem>>, vector<1x1x128xf32>
      tpu.vector_store %arg7[%c0_58, %c0_59, %c0_60], %84 {strides = array<i32>} : memref<1x1x128xf32, #tpu.memory_space<vmem>>, vector<1x1x128xf32>,
    } else {
    }
    %c128_i32 = arith.constant 128 : i32
    %3 = arith.muli %arg1, %c128_i32 : i32
    %c0_i32_1 = arith.constant 0 : i32
    %4 = arith.addi %3, %c0_i32_1 : i32
    %5 = tpu.assume_multiple %4, 8 : i32
    %c0 = arith.constant 0 : index
    %6 = arith.index_cast %5 : i32 to index
    %c0_2 = arith.constant 0 : index
    %7 = vector.load %arg2[%c0, %6, %c0_2] : memref<1x434x4xf32, #tpu.memory_space<vmem>>, vector<1x130x4xf32>
    %8 = vector.shape_cast %7 : vector<1x130x4xf32> to vector<130x4xf32>
    %9 = vector.extract_strided_slice %8 {offsets = [0, 0], sizes = [128, 4], strides = [1, 1]} : vector<130x4xf32> to vector<128x4xf32>
    %c0_3 = arith.constant 0 : index
    %c0_4 = arith.constant 0 : index
    %c0_5 = arith.constant 0 : index
    %10 = vector.load %arg3[%c0_3, %c0_4, %c0_5] : memref<9x4x128xf32, #tpu.memory_space<vmem>>, vector<1x4x128xf32>
    %11 = vector.shape_cast %10 : vector<1x4x128xf32> to vector<4x128xf32>
    %cst = arith.constant dense<0.000000e+00> : vector<128x128xf32>
    %12 = tpu.matmul %9, %11, %cst {dimension_numbers = #tpu.dot_dimension_numbers<[1], [0], [0], [1], [0, 0, 1, 1], [], []>} : vector<128x4xf32>, vector<4x128xf32>, vector<128x128xf32> -> vector<128x128xf32>
    %13 = vector.extract_strided_slice %8 {offsets = [1, 0], sizes = [128, 4], strides = [1, 1]} : vector<130x4xf32> to vector<128x4xf32>
    %c1 = arith.constant 1 : index
    %c0_6 = arith.constant 0 : index
    %c0_7 = arith.constant 0 : index
    %14 = vector.load %arg3[%c1, %c0_6, %c0_7] : memref<9x4x128xf32, #tpu.memory_space<vmem>>, vector<1x4x128xf32>
    %15 = vector.shape_cast %14 : vector<1x4x128xf32> to vector<4x128xf32>
    %cst_8 = arith.constant dense<0.000000e+00> : vector<128x128xf32>
    %16 = tpu.matmul %13, %15, %cst_8 {dimension_numbers = #tpu.dot_dimension_numbers<[1], [0], [0], [1], [0, 0, 1, 1], [], []>} : vector<128x4xf32>, vector<4x128xf32>, vector<128x128xf32> -> vector<128x128xf32>
    %17 = arith.addf %12, %16 : vector<128x128xf32>
    %18 = vector.extract_strided_slice %8 {offsets = [2, 0], sizes = [128, 4], strides = [1, 1]} : vector<130x4xf32> to vector<128x4xf32>
    %c2 = arith.constant 2 : index
    %c0_9 = arith.constant 0 : index
    %c0_10 = arith.constant 0 : index
    %19 = vector.load %arg3[%c2, %c0_9, %c0_10] : memref<9x4x128xf32, #tpu.memory_space<vmem>>, vector<1x4x128xf32>
    %20 = vector.shape_cast %19 : vector<1x4x128xf32> to vector<4x128xf32>
    %cst_11 = arith.constant dense<0.000000e+00> : vector<128x128xf32>
    %21 = tpu.matmul %18, %20, %cst_11 {dimension_numbers = #tpu.dot_dimension_numbers<[1], [0], [0], [1], [0, 0, 1, 1], [], []>} : vector<128x4xf32>, vector<4x128xf32>, vector<128x128xf32> -> vector<128x128xf32>
    %22 = arith.addf %17, %21 : vector<128x128xf32>
    %c24_i32 = arith.constant 24 : i32
    %23 = arith.addi %3, %c24_i32 : i32
    %24 = tpu.assume_multiple %23, 8 : i32
    %c0_12 = arith.constant 0 : index
    %25 = arith.index_cast %24 : i32 to index
    %c0_13 = arith.constant 0 : index
    %26 = vector.load %arg2[%c0_12, %25, %c0_13] : memref<1x434x4xf32, #tpu.memory_space<vmem>>, vector<1x130x4xf32>
    %27 = vector.shape_cast %26 : vector<1x130x4xf32> to vector<130x4xf32>
    %28 = vector.extract_strided_slice %27 {offsets = [0, 0], sizes = [128, 4], strides = [1, 1]} : vector<130x4xf32> to vector<128x4xf32>
    %c3 = arith.constant 3 : index
    %c0_14 = arith.constant 0 : index
    %c0_15 = arith.constant 0 : index
    %29 = vector.load %arg3[%c3, %c0_14, %c0_15] : memref<9x4x128xf32, #tpu.memory_space<vmem>>, vector<1x4x128xf32>
    %30 = vector.shape_cast %29 : vector<1x4x128xf32> to vector<4x128xf32>
    %cst_16 = arith.constant dense<0.000000e+00> : vector<128x128xf32>
    %31 = tpu.matmul %28, %30, %cst_16 {dimension_numbers = #tpu.dot_dimension_numbers<[1], [0], [0], [1], [0, 0, 1, 1], [], []>} : vector<128x4xf32>, vector<4x128xf32>, vector<128x128xf32> -> vector<128x128xf32>
    %32 = arith.addf %22, %31 : vector<128x128xf32>
    %33 = vector.extract_strided_slice %27 {offsets = [1, 0], sizes = [128, 4], strides = [1, 1]} : vector<130x4xf32> to vector<128x4xf32>
    %c4 = arith.constant 4 : index
    %c0_17 = arith.constant 0 : index
    %c0_18 = arith.constant 0 : index
    %34 = vector.load %arg3[%c4, %c0_17, %c0_18] : memref<9x4x128xf32, #tpu.memory_space<vmem>>, vector<1x4x128xf32>
    %35 = vector.shape_cast %34 : vector<1x4x128xf32> to vector<4x128xf32>
    %cst_19 = arith.constant dense<0.000000e+00> : vector<128x128xf32>
    %36 = tpu.matmul %33, %35, %cst_19 {dimension_numbers = #tpu.dot_dimension_numbers<[1], [0], [0], [1], [0, 0, 1, 1], [], []>} : vector<128x4xf32>, vector<4x128xf32>, vector<128x128xf32> -> vector<128x128xf32>
    %37 = arith.addf %32, %36 : vector<128x128xf32>
    %38 = vector.extract_strided_slice %27 {offsets = [2, 0], sizes = [128, 4], strides = [1, 1]} : vector<130x4xf32> to vector<128x4xf32>
    %c5 = arith.constant 5 : index
    %c0_20 = arith.constant 0 : index
    %c0_21 = arith.constant 0 : index
    %39 = vector.load %arg3[%c5, %c0_20, %c0_21] : memref<9x4x128xf32, #tpu.memory_space<vmem>>, vector<1x4x128xf32>
    %40 = vector.shape_cast %39 : vector<1x4x128xf32> to vector<4x128xf32>
    %cst_22 = arith.constant dense<0.000000e+00> : vector<128x128xf32>
    %41 = tpu.matmul %38, %40, %cst_22 {dimension_numbers = #tpu.dot_dimension_numbers<[1], [0], [0], [1], [0, 0, 1, 1], [], []>} : vector<128x4xf32>, vector<4x128xf32>, vector<128x128xf32> -> vector<128x128xf32>
    %42 = arith.addf %37, %41 : vector<128x128xf32>
    %c48_i32 = arith.constant 48 : i32
    %43 = arith.addi %3, %c48_i32 : i32
    %44 = tpu.assume_multiple %43, 8 : i32
    %c0_23 = arith.constant 0 : index
    %45 = arith.index_cast %44 : i32 to index
    %c0_24 = arith.constant 0 : index
    %46 = vector.load %arg2[%c0_23, %45, %c0_24] : memref<1x434x4xf32, #tpu.memory_space<vmem>>, vector<1x130x4xf32>
    %47 = vector.shape_cast %46 : vector<1x130x4xf32> to vector<130x4xf32>
    %48 = vector.extract_strided_slice %47 {offsets = [0, 0], sizes = [128, 4], strides = [1, 1]} : vector<130x4xf32> to vector<128x4xf32>
    %c6 = arith.constant 6 : index
    %c0_25 = arith.constant 0 : index
    %c0_26 = arith.constant 0 : index
    %49 = vector.load %arg3[%c6, %c0_25, %c0_26] : memref<9x4x128xf32, #tpu.memory_space<vmem>>, vector<1x4x128xf32>
    %50 = vector.shape_cast %49 : vector<1x4x128xf32> to vector<4x128xf32>
    %cst_27 = arith.constant dense<0.000000e+00> : vector<128x128xf32>
    %51 = tpu.matmul %48, %50, %cst_27 {dimension_numbers = #tpu.dot_dimension_numbers<[1], [0], [0], [1], [0, 0, 1, 1], [], []>} : vector<128x4xf32>, vector<4x128xf32>, vector<128x128xf32> -> vector<128x128xf32>
    %52 = arith.addf %42, %51 : vector<128x128xf32>
    %53 = vector.extract_strided_slice %47 {offsets = [1, 0], sizes = [128, 4], strides = [1, 1]} : vector<130x4xf32> to vector<128x4xf32>
    %c7 = arith.constant 7 : index
    %c0_28 = arith.constant 0 : index
    %c0_29 = arith.constant 0 : index
    %54 = vector.load %arg3[%c7, %c0_28, %c0_29] : memref<9x4x128xf32, #tpu.memory_space<vmem>>, vector<1x4x128xf32>
    %55 = vector.shape_cast %54 : vector<1x4x128xf32> to vector<4x128xf32>
    %cst_30 = arith.constant dense<0.000000e+00> : vector<128x128xf32>
    %56 = tpu.matmul %53, %55, %cst_30 {dimension_numbers = #tpu.dot_dimension_numbers<[1], [0], [0], [1], [0, 0, 1, 1], [], []>} : vector<128x4xf32>, vector<4x128xf32>, vector<128x128xf32> -> vector<128x128xf32>
    %57 = arith.addf %52, %56 : vector<128x128xf32>
    %58 = vector.extract_strided_slice %47 {offsets = [2, 0], sizes = [128, 4], strides = [1, 1]} : vector<130x4xf32> to vector<128x4xf32>
    %c8 = arith.constant 8 : index
    %c0_31 = arith.constant 0 : index
    %c0_32 = arith.constant 0 : index
    %59 = vector.load %arg3[%c8, %c0_31, %c0_32] : memref<9x4x128xf32, #tpu.memory_space<vmem>>, vector<1x4x128xf32>
    %60 = vector.shape_cast %59 : vector<1x4x128xf32> to vector<4x128xf32>
    %cst_33 = arith.constant dense<0.000000e+00> : vector<128x128xf32>
    %61 = tpu.matmul %58, %60, %cst_33 {dimension_numbers = #tpu.dot_dimension_numbers<[1], [0], [0], [1], [0, 0, 1, 1], [], []>} : vector<128x4xf32>, vector<4x128xf32>, vector<128x128xf32> -> vector<128x128xf32>
    %62 = arith.addf %57, %61 : vector<128x128xf32>
    %c0_34 = arith.constant 0 : index
    %c0_35 = arith.constant 0 : index
    %c0_36 = arith.constant 0 : index
    %63 = vector.load %arg5[%c0_34, %c0_35, %c0_36] : memref<1x128x128xf32, #tpu.memory_space<vmem>>, vector<1x128x128xf32>
    %64 = vector.shape_cast %63 : vector<1x128x128xf32> to vector<128x128xf32>
    %65 = vector.shape_cast %62 : vector<128x128xf32> to vector<1x128x128xf32>
    tpu.vector_store %arg5[%c0_34, %c0_35, %c0_36], %65 {strides = array<i32>} : memref<1x128x128xf32, #tpu.memory_space<vmem>>, vector<1x128x128xf32>,
    %c0_37 = arith.constant 0 : index
    %c0_38 = arith.constant 0 : index
    %66 = vector.load %arg4[%c0_37, %c0_38] : memref<128x1xf32, #tpu.memory_space<vmem>>, vector<128x1xf32>
    %67 = vector.broadcast %66 : vector<128x1xf32> to vector<128x128xf32>
    %68 = arith.mulf %62, %67 : vector<128x128xf32>
    %c0_39 = arith.constant 0 : index
    %c0_40 = arith.constant 0 : index
    %c0_41 = arith.constant 0 : index
    %69 = vector.load %arg6[%c0_39, %c0_40, %c0_41] : memref<1x1x128xf32, #tpu.memory_space<vmem>>, vector<1x1x128xf32>
    %cst_42 = arith.constant dense<0.000000e+00> : vector<128xf32>
    %70 = vector.multi_reduction <add>, %68, %cst_42 [0] : vector<128x128xf32> to vector<128xf32>
    %71 = vector.shape_cast %70 : vector<128xf32> to vector<1x128xf32>
    %72 = vector.shape_cast %71 : vector<1x128xf32> to vector<1x1x128xf32>
    %73 = arith.addf %69, %72 : vector<1x1x128xf32>
    %c0_43 = arith.constant 0 : index
    %c0_44 = arith.constant 0 : index
    %c0_45 = arith.constant 0 : index
    %74 = vector.load %arg6[%c0_43, %c0_44, %c0_45] : memref<1x1x128xf32, #tpu.memory_space<vmem>>, vector<1x1x128xf32>
    tpu.vector_store %arg6[%c0_43, %c0_44, %c0_45], %73 {strides = array<i32>} : memref<1x1x128xf32, #tpu.memory_space<vmem>>, vector<1x1x128xf32>,
    %c0_46 = arith.constant 0 : index
    %c0_47 = arith.constant 0 : index
    %c0_48 = arith.constant 0 : index
    %75 = vector.load %arg7[%c0_46, %c0_47, %c0_48] : memref<1x1x128xf32, #tpu.memory_space<vmem>>, vector<1x1x128xf32>
    %76 = arith.mulf %68, %68 : vector<128x128xf32>
    %cst_49 = arith.constant dense<0.000000e+00> : vector<128xf32>
    %77 = vector.multi_reduction <add>, %76, %cst_49 [0] : vector<128x128xf32> to vector<128xf32>
    %78 = vector.shape_cast %77 : vector<128xf32> to vector<1x128xf32>
    %79 = vector.shape_cast %78 : vector<1x128xf32> to vector<1x1x128xf32>
    %80 = arith.addf %75, %79 : vector<1x1x128xf32>
    %c0_50 = arith.constant 0 : index
    %c0_51 = arith.constant 0 : index
    %c0_52 = arith.constant 0 : index
    %81 = vector.load %arg7[%c0_50, %c0_51, %c0_52] : memref<1x1x128xf32, #tpu.memory_space<vmem>>, vector<1x1x128xf32>
    tpu.vector_store %arg7[%c0_50, %c0_51, %c0_52], %80 {strides = array<i32>} : memref<1x1x128xf32, #tpu.memory_space<vmem>>, vector<1x1x128xf32>,
    return
  }
  func.func @transform_0(%arg0: i32, %arg1: i32) -> (i32, i32, i32) {
    %c0_i32 = arith.constant 0 : i32
    %c0_i32_0 = arith.constant 0 : i32
    %c0_i32_1 = arith.constant 0 : i32
    return %arg0, %c0_i32, %c0_i32_0 : i32, i32, i32
  }
  func.func @transform_1(%arg0: i32, %arg1: i32) -> (i32, i32, i32) {
    %c0_i32 = arith.constant 0 : i32
    %c0_i32_0 = arith.constant 0 : i32
    %c0_i32_1 = arith.constant 0 : i32
    %c0_i32_2 = arith.constant 0 : i32
    return %c0_i32, %c0_i32_0, %c0_i32_1 : i32, i32, i32
  }
  func.func @transform_2(%arg0: i32, %arg1: i32) -> (i32, i32) {
    %c0_i32 = arith.constant 0 : i32
    %c0_i32_0 = arith.constant 0 : i32
    return %arg1, %c0_i32 : i32, i32
  }
  func.func @transform_3(%arg0: i32, %arg1: i32) -> (i32, i32, i32) {
    %c0_i32 = arith.constant 0 : i32
    %c0_i32_0 = arith.constant 0 : i32
    return %arg0, %arg1, %c0_i32 : i32, i32, i32
  }
  func.func @transform_4(%arg0: i32, %arg1: i32) -> (i32, i32, i32) {
    %c0_i32 = arith.constant 0 : i32
    %c0_i32_0 = arith.constant 0 : i32
    %c0_i32_1 = arith.constant 0 : i32
    return %arg0, %c0_i32, %c0_i32_0 : i32, i32, i32
  }
  func.func @transform_5(%arg0: i32, %arg1: i32) -> (i32, i32, i32) {
    %c0_i32 = arith.constant 0 : i32
    %c0_i32_0 = arith.constant 0 : i32
    %c0_i32_1 = arith.constant 0 : i32
    return %arg0, %c0_i32, %c0_i32_0 : i32, i32, i32
  }
}

</mosaic_0001>

<bundles_post_ra>
// kernel: tpu_custom_call.1
= control target key start
LH: loop header
LB: loop body
LE: loop exit
PB: predicated region body
PF: predicated region fallthrough
CT: control target
= control target key end

     0   :  { %11 = vsyncpa [#allocation3], 0  ;;  %s4736_s0 = inlined_call_operand.vmem [shape: f32[2,434,4], index: 0, kind: input, shape index: {}]   ;;  %s4737_s1 = inlined_call_operand.vmem [shape: f32[9,4,128], index: 1, kind: input, shape index: {}]   ;;  %s4738_s2 = inlined_call_operand.vmem [shape: f32[384,1], index: 2, kind: input, shape index: {}]   ;;  %s4739_s3 = inlined_call_operand.hbm [shape: f32[2,384,128], index: 3, kind: output, shape index: {0}]   ;;  %s4740_s4 = inlined_call_operand.hbm [shape: f32[2,1,128], index: 4, kind: output, shape index: {1}]   ;;  %s4741_s5 = inlined_call_operand.hbm [shape: f32[2,1,128], index: 5, kind: output, shape index: {2}]  }
   0x1   :  { %13 = vsyncpa [#allocation3 + $0x1], 0 }
   0x2   :  { %14 = vsyncpa [#allocation5], 0 }
   0x3   :  { %16 = vsyncpa [#allocation5 + $0x1], 0  ;;  %s3794_s18 = smov 0   ;;  %s3796_s19 = smov 0  }
   0x4   :  { %s3798_s20 = smov 0   ;;  %s3800_s21 = smov 0  }
   0x5   :  { %s3802_s22 = smov 0   ;;  %s3804_s23 = smov 0  }
   0x6   :  { %s3806_s24 = smov 0   ;;  %s3808_s25 = smov 0  }
   0x7   :  { %s3810_s26 = smov 0   ;;  %s3812_s27 = smov 0  }
   0x8   :  { %s3814_s28 = smov 0  }
   0x9 LB: > { %4755 = sst [smem:[#allocation9_spill]] %s3719_s19  ;;  %s4743_s29 = sadd.s32 4294967295, %s3755_s28   ;;  %s3755_s28 = sphi %s3814_s28, %s22_s28   ;;  %s3751_s27 = sphi %s3812_s27, %s4794_s27   ;;  %s3747_s26 = sphi %s3810_s26, %s4793_s26   ;;  %s3743_s25 = sphi %s3808_s25, %s4792_s25   ;;  %s3739_s24 = sphi %s3806_s24, %s4791_s24   ;;  %s3735_s23 = sphi %s3804_s23, %s4790_s23   ;;  %s3731_s22 = sphi %s3802_s22, %s4796_s22   ;;  %s3727_s21 = sphi %s3800_s21, %s4795_s21   ;;  %s3723_s20 = sphi %s3798_s20, %s4788_s20   ;;  %s3719_s19 = sphi %s3796_s19, %s4787_s19   ;;  %s3715_s18 = sphi %s3794_s18, %s4786_s18  }
   0xa   : > { %4756 = sst [smem:[#allocation10_spill]] %s3723_s20  ;;  %s4742_s30 = sadd.s32 4294967294, %s3755_s28  }
   0xb   : > { %4757 = sst [smem:[#allocation11_spill]] %s3735_s23  ;;  %s31_s6 = sadd.s32 1, %s3747_s26 }
   0xc   : > { %4758 = sst [smem:[#allocation12_spill]] %s3747_s26  ;;  %s34_s7 = sadd.s32 1, %s3751_s27 }
   0xd   : > { %4759 = sst [smem:[#allocation13_spill]] %s3751_s27  ;;  %p32_p0 = scmp.ge.s32.totalorder %s31_s6, 3 }
   0xe   : > { %s116_s8 = sadd.s32 1, %s3735_s23  ;;  %p126_p1 = scmp.ne.s32.totalorder %s3735_s23, %s3731_s22 }
   0xf   : > { %p3858_p2 = scmp.eq.s32.totalorder %s4743_s29, 5  ;;  %s4798_s6 = smov (%p32_p0, %s31_s6), 0 }
  0x10   : > { %4761 = sst [smem:[#allocation14_spill]] %s4798_s6  ;;  %s4800_s7 = smov (!%p32_p0, %s34_s7), %s3751_s27 }
  0x11   : > { %s112_s10 = ssub.s32 %s3747_s26, %s4798_s6  ;;  %p3869_p3 = por %p3858_p2, %p126_p1 }
  0x12   : > { %p36_p4 = scmp.ge.s32.totalorder %s4800_s7, 2  ;;  %p132_p5 = scmp.ne.s32.totalorder %s3731_s22, %s3727_s21 }
  0x13   : > { %p3877_p6 = scmp.eq.s32.totalorder %s4742_s30, 5  ;;  %s142_s13 = sadd.s32 1, %s3723_s20 }
  0x14   : > { %s4802_s7 = smov (%p36_p4, %s4800_s7), 0  ;;  %p152_p8 = scmp.ne.s32.totalorder %s3723_s20, %s3719_s19 }
  0x15   : > { %4764 = sst [smem:[#allocation15_spill]] %s4802_s7  ;;  %p3886_p7 = por %p3877_p6, %p132_p5 }
  0x16   : > { %s111_s15 = ssub.s32 %s3751_s27, %s4802_s7  ;;  %p158_p9 = scmp.ne.s32.totalorder %s3719_s19, %s3715_s18 }
  0x17   : > { %s113_s16 = sor.u32 %s112_s10, %s111_s15  ;;  %p140_p10 = scmp.eq.s32.totalorder %s111_s15, 0 }
  0x18   : > { %p114_p11 = scmp.eq.s32.totalorder %s113_s16, 0  ;;  %p3898_p12 = por %p152_p8, %p3858_p2 }
  0x19   : > { %s3903_s30 = scalar_select %p140_p10, %s3723_s20, %s142_s13  }
  0x1a   : > { %s3906_s29 = scalar_select %p114_p11, %s3735_s23, %s116_s8  }
  0x1b   : > { %4767 = sst [smem:[#allocation16_spill]] %s3903_s30  ;;  %p3910_p13 = por %p158_p9, %p3877_p6 }
  0x1c   : > { %4768 = sst [smem:[#allocation17_spill]] %s3906_s29  ;;  %p2736_p0 = scmp.ge.s32.totalorder %s3755_s28, 1 }
  0x1d   : > { %p223_p1 = scmp.lt.s32.totalorder %s3755_s28, 7 }
  0x1f   : > { %p224_p4 = pnand %p2736_p0, %p223_p1 }
  0x21   : > { %227 = sbr.rel (%p224_p4) target bundleno = 486 (0x1e6), region = 32 }
  0x28   : > { %s4749_s18 = sand.u32 1, %s3731_s22   ;;  %s256_s9 = sand.u32 1, %s3719_s19  }
  0x29   : > { %s2737_s8 = sshll.u32 %s4749_s18, 7  ;;  %p264_p2 = scmp.lt.s32.totalorder %s3743_s25, 1 }
  0x2a   : > { %s3922_s10 = sshll.u32 %s3739_s24, 4  ;;  %s3935_s18 = scalar_lea.vmem [#allocation2], %s2737_s8 }
  0x2b   : > { %p270_p5 = scmp.lt.s32.totalorder %s3922_s10, 47  ;;  %s3937_s20 = scalar_lea.vmem [#allocation4], %s256_s9 }
  0x2c   : > { %s265_s12 = scalar_select %p264_p2, %s3743_s25, 1 }
  0x2d   : > { %s271_s13 = scalar_select %p270_p5, %s3922_s10, 47 }
  0x2e   : > { %s3464_s15 = smul.u32 440, %s265_s12  ;;  %s3939_s19 = scalar_lea.vmem [#allocation6], %s256_s9 }
  0x2f   : > { %s2740_s16 = sshll.u32 %s271_s13, 3  ;;  %p2741_p6 = scmp.ne.s32.totalorder %s3739_s24, 0 }
  0x30   : > { %s268_s26 = scalar_lea.vmem %s4736_s0, %s3464_s15  ;;  %s3933_s30 = scalar_lea.vmem %s4738_s2, %s2740_s16  ;;  %v3757_v0 = vmov (!%p2741_p6), 0.0  }
  0x31   : > { %279 = sbr.rel (%p2741_p6) target bundleno = 56 (0x38), region = 36  ;;  %280 = vst [vmem:[%s3937_s20] sm:$0x1] (!%p2741_p6), %v3757_v0  ;;  %281 = vst [vmem:[%s3939_s19] sm:$0x1] (!%p2741_p6), %v3757_v0 }
  0x38 PF: > { %v2743_v1 = vld [vmem:[%s4737_s1 + $0x4] sm:$0xf]  ;;  %vm388_vm0 = vcmask 1043456   ;;  %v3950_v2 = vld [vmem:[%s4737_s1 + $0x10] sm:$0xf]  ;;  %s2742_s9 = sshll.u32 %s3739_s24, 7 }
  0x39   : > { %3100 = vmatprep.subr.msk.mxu1 %vm388_vm0, %v2743_v1  ;;  %3204 = vmatprep.subr.msk.mxu0 %vm388_vm0, %v3950_v2  ;;  %s3956_s8 = scalar_lea.vmem %s268_s26, %s2742_s9  ;;  %v301_v3 = vld [vmem:[%s4737_s1] sm:$0xf]  ;;  %v2850_v4 = vld [vmem:[%s4737_s1 + $0x14] sm:$0xf]  ;;  %vm321_vm1 = vcmask 1046528   ;;  %vm355_vm2 = vcmask 31744  }
  0x3a   : > { %3101 = vmatpush3.msk.msra.mxu1 %vm388_vm0, %v2743_v1  ;;  %3205 = vmatpush3.msk.msra.mxu0 %vm388_vm0, %v3950_v2  ;;  %v3968_v5 = vld [vmem:[%s3956_s8] sm:$0xff]  ;;  %v3971_v6 = vld [vmem:[%s3956_s8 + $0x8] sm:$0xff]  ;;  %v3974_v7 = vld [vmem:[%s3956_s8 + $0x18] sm:$0xff]  ;;  %vm719_vm3 = vcmask 1045504   ;;  %s2557_s16 = sshll.u32 %s3935_s18, 4  ;;  %s4783_s7 = sand.u32 1, %s3731_s22   ;;  %s4593_s16 = int_to_ptr.vmem [resolvable:$true] %s2557_s16 }
  0x3b   : > { %v322_v8 = vrot.slane %v3968_v5, 1  ;;  %v323_v9 = vrot.slane %v3971_v6, 1  ;;  %3126 = vmatprep.subr.msk.mxu1 %vm388_vm0, %v301_v3  ;;  %v3980_v10 = vld [vmem:[%s3956_s8 + $0x20] sm:$0xff]  ;;  %v1185_v11 = vrot.slane %v3974_v7, 1  ;;  %3230 = vmatprep.subr.msk.mxu0 %vm388_vm0, %v2850_v4  ;;  %v3985_v12 = vld [vmem:[%s3956_s8 + $0x10] sm:$0xff]  ;;  %v3988_v13 = vld [vmem:[%s3956_s8 + $0x28] sm:$0xff] }
  0x3c   : > { %v1186_v14 = vrot.slane %v3980_v10, 1  ;;  %v325_v15 = vrot.slane %v3985_v12, 1  ;;  %v1188_v16 = vrot.slane %v3988_v13, 1  ;;  %v3994_v17 = vld [vmem:[%s3956_s8 + $0x30] sm:$0xff]  ;;  %v3997_v18 = vld [vmem:[%s3956_s8 + $0x38] sm:$0xff]  ;;  %v4003_v22 = vld [vmem:[%s3956_s8 + $0x40] sm:$0xff] }
  0x3d   : > { %v324_v19 = vsel %vm321_vm1, %v322_v8, %v323_v9  ;;  %v1190_v20 = vrot.slane %v3994_v17, 1  ;;  %v1192_v21 = vrot.slane %v3997_v18, 1  ;;  %v4011_v27 = vld [vmem:[%s3956_s8 + $0x48] sm:$0xff]  ;;  %v1194_v29 = vrot.slane %v4003_v22, 1  ;;  %v4018_v30 = vld [vmem:[%s3956_s8 + $0x50] sm:$0xff]  ;;  %v4044_v37 = vld [vmem:[%s3956_s8 + $0x58] sm:$0xff] }
  0x3e   : > { %3102 = vmatprep.mubr.msk.f32.mxu1 %vm355_vm2, %v324_v19  ;;  %v1187_v23 = vsel %vm321_vm1, %v1185_v11, %v1186_v14  ;;  %v326_v24 = vsel %vm321_vm1, %v323_v9, %v325_v15  ;;  %v1189_v25 = vsel %vm321_vm1, %v1186_v14, %v1188_v16  ;;  %v328_v26 = vsel %vm321_vm1, %v325_v15, %v1185_v11  ;;  %v4023_v31 = vld [vmem:[%s4737_s1 + $0x18] sm:$0xf]  ;;  %v4036_v34 = vld [vmem:[%s4737_s1 + $0x8] sm:$0xf]  ;;  %v4055_v38 = vld [vmem:[%s3956_s8 + $0x60] sm:$0xff]  ;;  %s4599_s23 = scalar_lea.sflag [#allocation3], %s4783_s7 }
  0x3f   : > { %3206 = vmatprep.mubr.msk.f32.mxu0 %vm355_vm2, %v1187_v23  ;;  %3103 = vmatmul.mubr.msk.f32.vlgmr.msra.gmra.mrb[0].mxu1 %vm355_vm2, %v326_v24  ;;  %v1191_v28 = vsel %vm321_vm1, %v1188_v16, %v1190_v20  ;;  %v4030_v32 = vsel %vm321_vm1, %v1190_v20, %v1192_v21  ;;  %v1196_v33 = vrot.slane %v4011_v27, 1  ;;  %v4040_v35 = vsel %vm321_vm1, %v1192_v21, %v1194_v29  ;;  %v4064_v41 = vld [vmem:[%s3956_s8 + $0x68] sm:$0xff]  ;;  %v4087_v51 = vld [vmem:[%s3956_s8 + $0x70] sm:$0xff]  ;;  %v4098_v54 = vld [vmem:[%s3956_s8 + $0x78] sm:$0xff]  ;;  %s3577_s29 = scalar_lea.vmem %s4593_s16, 2048  ;;  %s3759_s9 = smov [#allocation2]  }
  0x40   : > { %3127 = vmatpush3.msk.msra.mxu1 %vm388_vm0, %v301_v3  ;;  %3207 = vmatmul.mubr.msk.f32.vlgmr.msra.gmra.mrb[0].mxu0 %vm355_vm2, %v1189_v25  ;;  %v1198_v36 = vrot.slane %v4018_v30, 1  ;;  %v1200_v40 = vrot.slane %v4044_v37, 1  ;;  %v1419_v42 = vrot.slane %v3988_v13, 2  ;;  %v4753_v44 = vrot.slane %v3974_v7, 2  ;;  %v4113_v59 = vld [vmem:[%s3956_s8 + $0x80] sm:$0xff]  ;;  %v4130_v0 = vld [vmem:[%s3956_s8 + $0x90] sm:$0xff]  ;;  %p3578_p8 = scmp.ne.s32.totalorder %s4593_s16, %s3577_s29 }
  0x41   : > { %3231 = vmatpush3.msk.msra.mxu0 %vm388_vm0, %v2850_v4  ;;  %3105 = vmatprep.mubr.msk.f32.mxu1 %vm355_vm2, %v328_v26  ;;  %v4060_v39 = vsel %vm321_vm1, %v1194_v29, %v1196_v33  ;;  %v1417_v45 = vrot.slane %v3980_v10, 2  ;;  %v1421_v46 = vrot.slane %v3994_v17, 2  ;;  %v345_v47 = vrot.slane %v4055_v38, 1  ;;  %v4127_v63 = vld [vmem:[%s3956_s8 + $0x80] sm:$0x3]  ;;  %v4134_v3 = vld [vmem:[%s3956_s8 + $0x98] sm:$0xff] }
  0x42   : > { %3209 = vmatprep.mubr.msk.f32.mxu0 %vm355_vm2, %v1191_v28  ;;  %3256 = vmatprep.subr.msk.mxu0 %vm388_vm0, %v4023_v31  ;;  %v4068_v43 = vsel %vm321_vm1, %v1196_v33, %v1198_v36  ;;  %v1423_v48 = vrot.slane %v3997_v18, 2  ;;  %v4754_v49 = vrot.slane %v4064_v41, 1  ;;  %v4084_v50 = vsel %vm321_vm1, %v1198_v36, %v1200_v40  ;;  %v4137_v4 = vld [vmem:[%s3956_s8 + $0xa0] sm:$0xff]  ;;  %v2885_v15 = vld [vmem:[%s3956_s8 + $0xb0] sm:$0x3]  ;;  %p3579_p9 = pnand %p3578_p8, %p3869_p3  ;;  %s3581_s12 = sshll.u32 %s3759_s9, 4  ;;  %s3582_s12 = int_to_ptr.vmem [resolvable:$false] %s3581_s12 }
  0x43   : > { %3106 = vmatmul.mubr.msk.f32.gmra.mrb[2].mxu1 %vm355_vm2, %v1187_v23  ;;  %3152 = vmatprep.subr.msk.mxu1 %vm388_vm0, %v4036_v34  ;;  %v4092_v52 = vsel %vm719_vm3, %v4753_v44, %v1417_v45  ;;  %v4095_v53 = vsel %vm719_vm3, %v1417_v45, %v1419_v42  ;;  %v4103_v55 = vsel %vm719_vm3, %v1419_v42, %v1421_v46  ;;  %v1425_v58 = vrot.slane %v4003_v22, 2  ;;  %v4155_v23 = vld [vmem:[%s3956_s8 + $0xa8] sm:$0xff]  ;;  %v4162_v24 = vld [vmem:[%s4737_s1 + $0x1c] sm:$0xf]  ;;  %p3584_p11 = scmp.lt.s32.totalorder %s4593_s16, %s3582_s12 }
  0x44   : > { %3210 = vmatmul.mubr.msk.f32.gmra.mrb[2].mxu0 %vm355_vm2, %v4030_v32  ;;  %3108 = vmatprep.mubr.msk.f32.mxu1 %vm355_vm2, %v1189_v25  ;;  %v4106_v56 = vsel %vm321_vm1, %v1200_v40, %v345_v47  ;;  %v4109_v57 = vsel %vm719_vm3, %v1421_v46, %v1423_v48  ;;  %v4122_v60 = vsel %vm321_vm1, %v345_v47, %v4754_v49  ;;  %v349_v61 = vrot.slane %v4087_v51, 1  ;;  %v4183_v40 = vld [vmem:[%s3956_s8 + $0x98] sm:$0x3]  ;;  %p3580_p10 = pneg %p3579_p9 }
  0x45   : > { %3212 = vmatprep.mubr.msk.f32.mxu0 %vm355_vm2, %v4040_v35  ;;  %v1427_v62 = vrot.slane %v4011_v27, 2  ;;  %v4752_v1 = vrot.slane %v4113_v59, 1  ;;  %v351_v8 = vrot.slane %v4098_v54, 1  ;;  %v1429_v9 = vrot.slane %v4018_v30, 2 }
  0x46   : > { %v4144_v11 = vrot.slane %v4098_v54, 2  ;;  %v1906_v14 = vrot.slane %v4134_v3, 1  ;;  %v4149_v16 = vrot.slane %v4130_v0, 1  ;;  %v2137_v19 = vrot.slane %v4134_v3, 2 }
  0x47   : > { %3109 = vmatmul.mubr.msk.f32.gmra.mrb[4].mxu1 %vm355_vm2, %v1191_v28  ;;  %v1908_v20 = vrot.slane %v4137_v4, 1  ;;  %v2139_v21 = vrot.slane %v4137_v4, 2  ;;  %v1910_v25 = vrot.slane %v4155_v23, 1  ;;  %v2141_v26 = vrot.slane %v4155_v23, 2 }
  0x48   : > { %3213 = vmatmul.mubr.msk.f32.gmra.mrb[4].mxu0 %vm355_vm2, %v4060_v39  ;;  %3111 = vmatprep.mubr.msk.f32.mxu1 %vm355_vm2, %v4030_v32  ;;  %v751_v28 = vrot.slane %v4127_v63, 2  ;;  %v4170_v29 = vsel %vm321_vm1, %v351_v8, %v4752_v1  ;;  %v4177_v33 = vsel %vm719_vm3, %v1423_v48, %v1425_v58  ;;  %v4180_v36 = vrot.slane %v4130_v0, 2 }
  0x49   : > { %3215 = vmatprep.mubr.msk.f32.mxu0 %vm355_vm2, %v4068_v43  ;;  %v4187_v42 = vsel %vm321_vm1, %v4149_v16, %v1906_v14  ;;  %v1912_v45 = vrot.slane %v2885_v15, 1  ;;  %v4198_v47 = vsel %vm321_vm1, %v1906_v14, %v1908_v20  ;;  %v4201_v48 = vsel %vm321_vm1, %v1908_v20, %v1910_v25 }
  0x4a   : > { %v4195_v46 = vsel %vm719_vm3, %v4144_v11, %v751_v28  ;;  %v1216_v1 = vrot.slane %v4183_v40, 1  ;;  %v4211_v44 = vsel %vm719_vm3, %v4180_v36, %v2137_v19  ;;  %v4214_v28 = vsel %vm719_vm3, %v2137_v19, %v2139_v21 }
  0x4b   : > { %3112 = vmatmul.mubr.msk.f32.gmra.mrb[6].mxu1 %vm355_vm2, %v4040_v35  ;;  %4770 = vst [vmem:[#allocation18_spill] sm:$0xff] %v4211_v44  ;;  %4771 = vst [vmem:[#allocation19_spill] sm:$0xff] %v4214_v28  ;;  %v4217_v14 = vsel %vm719_vm3, %v2139_v21, %v2141_v26  ;;  %v2143_v49 = vrot.slane %v2885_v15, 2  ;;  %v4774_v19 = vrot.slane %v4064_v41, 1  ;;  %v4243_v15 = vsel %vm321_vm1, %v349_v61, %v351_v8 }
  0x4c   : > { %3216 = vmatmul.mubr.msk.f32.gmra.mrb[6].mxu0 %vm355_vm2, %v4084_v50  ;;  %3114 = vmatprep.mubr.msk.f32.mxu1 %vm355_vm2, %v4060_v39  ;;  %4772 = vst [vmem:[#allocation20_spill] sm:$0xff] %v4217_v14  ;;  %v4223_v20 = vsel %vm321_vm1, %v4149_v16, %v1216_v1  ;;  %v2359_v14 = vld [vmem:[%s3933_s30 + $0x10] sm:$0xff]  ;;  %v4240_v1 = vsel %vm719_vm3, %v1425_v58, %v1427_v62  ;;  %v1433_v44 = vrot.slane %v4055_v38, 2  ;;  %v2358_v58 = vld [vmem:[%s3933_s30 + $0x8] sm:$0xff] }
  0x4d   : > { %3232 = vmatprep.mubr.msk.f32.mxu0 %vm355_vm2, %v4092_v52  ;;  %4773 = vst [vmem:[#allocation21_spill] sm:$0xff] %v4223_v20  ;;  %v4233_v21 = vsel %vm321_vm1, %v4774_v19, %v349_v61  ;;  %v1431_v20 = vrot.slane %v4044_v37, 2  ;;  %v4247_v28 = vsel %vm719_vm3, %v2141_v26, %v2143_v49  ;;  %v3758_v19 = vmov 0   ;;  %v2360_v61 = vld [vmem:[%s3933_s30 + $0x18] sm:$0xff] }
  0x4e   : > { %4775 = vst [vmem:[#allocation22_spill] sm:$0xff] %v4247_v28  ;;  %3575 = vset.pattern.permute.xlu0 %v3758_v19  ;;  %3576 = vset.pattern.permute.xlu1 %v3758_v19  ;;  %v1435_v26 = vrot.slane %v4064_v41, 2  ;;  %v1441_v19 = vrot.slane %v4113_v59, 2  ;;  %v2367_v28 = vld [vmem:[%s3933_s30 + $0x50] sm:$0xff] }
  0x4f   : > { %3115 = vmatmul.mubr.msk.f32.gmra.mrb[8].mxu1 %vm355_vm2, %v4068_v43  ;;  %2385 = vperm.xlu1 %3576, %v2359_v14   ;;  %v4269_v14 = vsel %vm719_vm3, %v1431_v20, %v1433_v44 }
  0x50   : > { %3233 = vmatmul.mubr.msk.f32.vlgmr.msra.gmra.mrb[0].mxu0 %vm355_vm2, %v4095_v53  ;;  %3117 = vmatprep.mubr.msk.f32.mxu1 %vm355_vm2, %v4084_v50 }
  0x51   : > { %3257 = vmatpush3.msk.msra.mxu0 %vm388_vm0, %v4023_v31  ;;  %3235 = vmatprep.mubr.msk.f32.mxu0 %vm355_vm2, %v4103_v55  ;;  %v4207_v31 = vsel %vm321_vm1, %v1910_v25, %v1912_v45  ;;  %v2357_v25 = vld [vmem:[%s3933_s30] sm:$0xff]  ;;  %v353_v45 = vrot.slane %v4127_v63, 1  ;;  %v4250_v63 = vsel %vm719_vm3, %v1427_v62, %v1429_v9  ;;  %v4265_v62 = vsel %vm719_vm3, %v1429_v9, %v1431_v20  ;;  %v2362_v9 = vld [vmem:[%s3933_s30 + $0x28] sm:$0xff] }
  0x52   : > { %3282 = vmatprep.subr.msk.mxu0 %vm388_vm0, %v4162_v24  ;;  %2375 = vperm.xlu0 %3575, %v2357_v25   ;;  %v1437_v25 = vrot.slane %v4087_v51, 2  ;;  %v4282_v20 = vsel %vm719_vm3, %v1433_v44, %v1435_v26  ;;  %v2363_v44 = vld [vmem:[%s3933_s30 + $0x30] sm:$0xff] }
  0x53   : > { %3118 = vmatmul.mubr.msk.f32.gmra.mrb[10].mxu1 %vm355_vm2, %v4106_v56  ;;  %v354_v49 = vsel %vm321_vm1, %v351_v8, %v353_v45  ;;  %2390 = vperm.xlu1 %3576, %v2360_v61   ;;  %v2361_v8 = vld [vmem:[%s3933_s30 + $0x20] sm:$0xff]  ;;  %v2364_v61 = vld [vmem:[%s3933_s30 + $0x38] sm:$0xff] }
  0x54   : > { %3236 = vmatmul.mubr.msk.f32.gmra.mrb[2].mxu0 %vm355_vm2, %v4109_v57  ;;  %3120 = vmatprep.mubr.msk.f32.mxu1 %vm355_vm2, %v4122_v60  ;;  %v4285_v45 = vsel %vm719_vm3, %v1435_v26, %v1437_v25  ;;  %v4310_v26 = vsel %vm719_vm3, %v1437_v25, %v4144_v11  ;;  %v2366_v25 = vld [vmem:[%s3933_s30 + $0x48] sm:$0xff] }
  0x55   : > { %3238 = vmatprep.mubr.msk.f32.mxu0 %vm355_vm2, %v4177_v33 }
  0x56   : > { %2380 = vperm.xlu0 %3575, %v2358_v58   ;;  %v4289_v58 = vld [vmem:[%s3956_s8 + $0x88] sm:$0xff]  ;;  %s3583_s8 = scalar_lea.vmem %s3582_s12, 4096 }
  0x57   : > { %3121 = vmatmul.mubr.msk.f32.gmra.mrb[12].mxu1 %vm355_vm2, %v4233_v21  ;;  %2400 = vperm.xlu1 %3576, %v2362_v9   ;;  %v4315_v9 = vsel %vm719_vm3, %v4144_v11, %v1441_v19  ;;  %p3585_p0 = scmp.lt.s32.totalorder %s3583_s8, %s3577_s29 }
  0x58   : > { %3239 = vmatmul.mubr.msk.f32.gmra.mrb[4].mxu0 %vm355_vm2, %v4240_v1  ;;  %3123 = vmatprep.mubr.msk.f32.mxu1 %vm355_vm2, %v4243_v15 }
  0x59   : > { %3241 = vmatprep.mubr.msk.f32.mxu0 %vm355_vm2, %v4250_v63  ;;  %p3586_p1 = por %p3585_p0, %p3584_p11 }
  0x5a   : > { %2395 = vperm.xlu0 %3575, %v2361_v8   ;;  %v1443_v8 = vrot.slane %v4289_v58, 2 }
  0x5b   : > { %3124 = vmatmul.mubr.msk.f32.gmra.mrb[14].mxu1 %vm355_vm2, %v354_v49  ;;  %v4296_v49 = vld [vmem:[%s4737_s1 + $0xc] sm:$0xf]  ;;  %2410 = vperm.xlu1 %3576, %v2364_v61   ;;  %p3587_p4 = pnand %p3586_p1, %p3580_p10 }
  0x5c   : > { %3242 = vmatmul.mubr.msk.f32.gmra.mrb[6].mxu0 %vm355_vm2, %v4265_v62  ;;  %3128 = vmatprep.mubr.msk.f32.mxu1 %vm355_vm2, %v3968_v5  ;;  %v4330_v11 = vsel %vm719_vm3, %v1441_v19, %v1443_v8  ;;  %v4335_v61 = vsel %vm719_vm3, %v1443_v8, %v4180_v36  ;;  %v2368_v19 = vld [vmem:[%s3933_s30 + $0x58] sm:$0xff]  ;;  %v2369_v8 = vld [vmem:[%s3933_s30 + $0x60] sm:$0xff] }
  0x5d   : > { %3244 = vmatprep.mubr.msk.f32.mxu0 %vm355_vm2, %v4269_v14 }
  0x5e   : > { %2405 = vperm.xlu0 %3575, %v2363_v44   ;;  %v1447_v44 = vrot.slane %v4183_v40, 2 }
  0x5f   : > { %3129 = vmatmul.mubr.msk.f32.vlgmr.msra.gmra.mrb[0].mxu1 %vm355_vm2, %v3971_v6  ;;  %2420 = vperm.xlu1 %3576, %v2366_v25   ;;  %v2372_v25 = vld [vmem:[%s3933_s30 + $0x78] sm:$0xff] }
  0x60   : > { %3153 = vmatpush3.msk.msra.mxu1 %vm388_vm0, %v4036_v34  ;;  %3245 = vmatmul.mubr.msk.f32.gmra.mrb[8].mxu0 %vm355_vm2, %v4282_v20  ;;  %v2365_v34 = vld [vmem:[%s3933_s30 + $0x40] sm:$0xff]  ;;  %v1448_v40 = vsel %vm719_vm3, %v4180_v36, %v1447_v44  ;;  %v721_v44 = vrot.slane %v3971_v6, 2  ;;  %v4776_v6 = vrot.slane %v3974_v7, 2 }
  0x61   : > { %3131 = vmatprep.mubr.msk.f32.mxu1 %vm355_vm2, %v3985_v12  ;;  %3247 = vmatprep.mubr.msk.f32.mxu0 %vm355_vm2, %v4285_v45  ;;  %v2922_v36 = vld [vmem:[%s4737_s1 + $0x20] sm:$0xf] }
  0x62   : > { %3178 = vmatprep.subr.msk.mxu1 %vm388_vm0, %v4296_v49  ;;  %2415 = vperm.xlu0 %3575, %v2365_v34   ;;  %v2370_v34 = vld [vmem:[%s3933_s30 + $0x68] sm:$0xff] }
  0x63   : > { %3132 = vmatmul.mubr.msk.f32.gmra.mrb[2].mxu1 %vm355_vm2, %v3974_v7  ;;  %2430 = vperm.xlu1 %3576, %v2368_v19   ;;  %v723_v19 = vrot.slane %v3985_v12, 2 }
  0x64   : > { %3248 = vmatmul.mubr.msk.f32.gmra.mrb[10].mxu0 %vm355_vm2, %v4310_v26  ;;  %3134 = vmatprep.mubr.msk.f32.mxu1 %vm355_vm2, %v3980_v10 }
  0x65   : > { %3250 = vmatprep.mubr.msk.f32.mxu0 %vm355_vm2, %v4315_v9  ;;  %v726_v12 = vsel %vm719_vm3, %v723_v19, %v4776_v6 }
  0x66   : > { %2425 = vperm.xlu0 %3575, %v2367_v28   ;;  %v2371_v28 = vld [vmem:[%s3933_s30 + $0x70] sm:$0xff]  ;;  %s3465_s30 = smul.u32 48, %s3743_s25 }
  0x67   : > { %3135 = vmatmul.mubr.msk.f32.gmra.mrb[4].mxu1 %vm355_vm2, %v3988_v13  ;;  %2440 = vperm.xlu1 %3576, %v2370_v34  }
  0x68   : > { %3251 = vmatmul.mubr.msk.f32.gmra.mrb[12].mxu0 %vm355_vm2, %v4330_v11  ;;  %3137 = vmatprep.mubr.msk.f32.mxu1 %vm355_vm2, %v3994_v17  ;;  %s4581_s15 = sadd.s32 %s3465_s30, %s3922_s10 }
  0x69   : > { %3253 = vmatprep.mubr.msk.f32.mxu0 %vm355_vm2, %v4335_v61  ;;  %s2942_s10 = sshll.u32 %s4581_s15, 7 }
  0x6a   : > { %2435 = vperm.xlu0 %3575, %v2369_v8   ;;  %s4591_s27 = scalar_lea.hbm %s4739_s3, %s2942_s10 }
  0x6b   : > { %3138 = vmatmul.mubr.msk.f32.gmra.mrb[6].mxu1 %vm355_vm2, %v3997_v18  ;;  %2450 = vperm.xlu1 %3576, %v2372_v25  }
  0x6c   : > { %3254 = vmatmul.mubr.msk.f32.gmra.mrb[14].mxu0 %vm355_vm2, %v1448_v40  ;;  %3140 = vmatprep.mubr.msk.f32.mxu1 %vm355_vm2, %v4003_v22 }
  0x6d   : > { %3258 = vmatprep.mubr.msk.f32.mxu0 %vm355_vm2, %v3994_v17 }
  0x6e   : > { %2445 = vperm.xlu0 %3575, %v2371_v28  }
  0x6f   : > { %3141 = vmatmul.mubr.msk.f32.gmra.mrb[8].mxu1 %vm355_vm2, %v4011_v27 }
  0x70   : > { %3259 = vmatmul.mubr.msk.f32.vlgmr.msra.gmra.mrb[0].mxu0 %vm355_vm2, %v3997_v18  ;;  %3143 = vmatprep.mubr.msk.f32.mxu1 %vm355_vm2, %v4018_v30 }
  0x71   : > { %3283 = vmatpush3.msk.msra.mxu0 %vm388_vm0, %v4162_v24  ;;  %3261 = vmatprep.mubr.msk.f32.mxu0 %vm355_vm2, %v4003_v22  ;;  %v720_v24 = vrot.slane %v3968_v5, 2  ;;  %v724_v5 = vsel %vm719_vm3, %v721_v44, %v723_v19 }
  0x72   : > { %3308 = vmatprep.subr.msk.mxu0 %vm388_vm0, %v2922_v36 }
  0x73   : > { %3144 = vmatmul.mubr.msk.f32.gmra.mrb[10].mxu1 %vm355_vm2, %v4044_v37  ;;  %v722_v40 = vsel %vm719_vm3, %v720_v24, %v721_v44 }
  0x74   : > { %3262 = vmatmul.mubr.msk.f32.gmra.mrb[2].mxu0 %vm355_vm2, %v4011_v27  ;;  %3146 = vmatprep.mubr.msk.f32.mxu1 %vm355_vm2, %v4055_v38 }
  0x75   : > { %3264 = vmatprep.mubr.msk.f32.mxu0 %vm355_vm2, %v4018_v30 }
  0x77   : > { %3147 = vmatmul.mubr.msk.f32.gmra.mrb[12].mxu1 %vm355_vm2, %v4064_v41 }
  0x78   : > { %3265 = vmatmul.mubr.msk.f32.gmra.mrb[4].mxu0 %vm355_vm2, %v4044_v37  ;;  %3149 = vmatprep.mubr.msk.f32.mxu1 %vm355_vm2, %v4087_v51 }
  0x79   : > { %3267 = vmatprep.mubr.msk.f32.mxu0 %vm355_vm2, %v4055_v38 }
  0x7b   : > { %3150 = vmatmul.mubr.msk.f32.gmra.mrb[14].mxu1 %vm355_vm2, %v4098_v54 }
  0x7c   : > { %3268 = vmatmul.mubr.msk.f32.gmra.mrb[6].mxu0 %vm355_vm2, %v4064_v41  ;;  %3154 = vmatprep.mubr.msk.f32.mxu1 %vm355_vm2, %v722_v40 }
  0x7d   : > { %3270 = vmatprep.mubr.msk.f32.mxu0 %vm355_vm2, %v4087_v51 }
  0x7f   : > { %3155 = vmatmul.mubr.msk.f32.vlgmr.msra.gmra.mrb[0].mxu1 %vm355_vm2, %v724_v5 }
  0x80   : > { %3179 = vmatpush3.msk.msra.mxu1 %vm388_vm0, %v4296_v49  ;;  %3271 = vmatmul.mubr.msk.f32.gmra.mrb[8].mxu0 %vm355_vm2, %v4098_v54 }
  0x81   : > { %3157 = vmatprep.mubr.msk.f32.mxu1 %vm355_vm2, %v726_v12  ;;  %3273 = vmatprep.mubr.msk.f32.mxu0 %vm355_vm2, %v4113_v59 }
  0x82   : > { %3334 = vmatprep.subr.msk.mxu1 %vm388_vm0, %v3950_v2 }
  0x83   : > { %3158 = vmatmul.mubr.msk.f32.gmra.mrb[2].mxu1 %vm355_vm2, %v4092_v52 }
  0x84   : > { %3274 = vmatmul.mubr.msk.f32.gmra.mrb[10].mxu0 %vm355_vm2, %v4289_v58  ;;  %3160 = vmatprep.mubr.msk.f32.mxu1 %vm355_vm2, %v4095_v53 }
  0x85   : > { %3276 = vmatprep.mubr.msk.f32.mxu0 %vm355_vm2, %v4130_v0 }
  0x87   : > { %3161 = vmatmul.mubr.msk.f32.gmra.mrb[4].mxu1 %vm355_vm2, %v4103_v55 }
  0x88   : > { %3277 = vmatmul.mubr.msk.f32.gmra.mrb[12].mxu0 %vm355_vm2, %v4134_v3  ;;  %3163 = vmatprep.mubr.msk.f32.mxu1 %vm355_vm2, %v4109_v57 }
  0x89   : > { %3279 = vmatprep.mubr.msk.f32.mxu0 %vm355_vm2, %v4137_v4 }
  0x8b   : > { %3164 = vmatmul.mubr.msk.f32.gmra.mrb[6].mxu1 %vm355_vm2, %v4177_v33 }
  0x8c   : > { %3280 = vmatmul.mubr.msk.f32.gmra.mrb[14].mxu0 %vm355_vm2, %v4155_v23  ;;  %3166 = vmatprep.mubr.msk.f32.mxu1 %vm355_vm2, %v4240_v1 }
  0x8d   : > { %3284 = vmatprep.mubr.msk.f32.mxu0 %vm355_vm2, %v4030_v32  ;;  %v1902_v32 = vrot.slane %v4289_v58, 1 }
  0x8f   : > { %3167 = vmatmul.mubr.msk.f32.gmra.mrb[8].mxu1 %vm355_vm2, %v4250_v63 }
  0x90   : > { %3285 = vmatmul.mubr.msk.f32.vlgmr.msra.gmra.mrb[0].mxu0 %vm355_vm2, %v4040_v35  ;;  %3169 = vmatprep.mubr.msk.f32.mxu1 %vm355_vm2, %v4265_v62  ;;  %v4777_v35 = vrot.slane %v4113_v59, 1 }
  0x91   : > { %3309 = vmatpush3.msk.msra.mxu0 %vm388_vm0, %v2922_v36  ;;  %3287 = vmatprep.mubr.msk.f32.mxu0 %vm355_vm2, %v4060_v39 }
  0x92   : > { %v1903_v39 = vsel %vm321_vm1, %v4777_v35, %v1902_v32 }
  0x93   : > { %3170 = vmatmul.mubr.msk.f32.gmra.mrb[10].mxu1 %vm355_vm2, %v4269_v14 }
  0x94   : > { %3288 = vmatmul.mubr.msk.f32.gmra.mrb[2].mxu0 %vm355_vm2, %v4068_v43  ;;  %3172 = vmatprep.mubr.msk.f32.mxu1 %vm355_vm2, %v4282_v20 }
  0x95   : > { %3290 = vmatprep.mubr.msk.f32.mxu0 %vm355_vm2, %v4084_v50 }
  0x97   : > { %3173 = vmatmul.mubr.msk.f32.gmra.mrb[12].mxu1 %vm355_vm2, %v4285_v45 }
  0x98   : > { %3291 = vmatmul.mubr.msk.f32.gmra.mrb[4].mxu0 %vm355_vm2, %v4106_v56  ;;  %3175 = vmatprep.mubr.msk.f32.mxu1 %vm355_vm2, %v4310_v26 }
  0x99   : > { %3293 = vmatprep.mubr.msk.f32.mxu0 %vm355_vm2, %v4122_v60 }
  0x9b   : > { %3176 = vmatmul.mubr.msk.f32.gmra.mrb[14].mxu1 %vm355_vm2, %v4195_v46 }
  0x9c   : > { %3294 = vmatmul.mubr.msk.f32.gmra.mrb[6].mxu0 %vm355_vm2, %v4233_v21  ;;  %3180 = vmatprep.mubr.msk.f32.mxu1 %vm355_vm2, %v3974_v7  ;;  %v1905_v7 = vsel %vm321_vm1, %v1902_v32, %v4149_v16 }
  0x9d   : > { %3296 = vmatprep.mubr.msk.f32.mxu0 %vm355_vm2, %v4243_v15 }
  0x9f   : > { %3181 = vmatmul.mubr.msk.f32.vlgmr.msra.gmra.mrb[0].mxu1 %vm355_vm2, %v3980_v10  ;;  %v4779_v10 = vld [vmem:[#allocation19_spill] sm:$0xff] }
  0xa0   : > { %3335 = vmatpush3.msk.msra.mxu1 %vm388_vm0, %v3950_v2  ;;  %3297 = vmatmul.mubr.msk.f32.gmra.mrb[8].mxu0 %vm355_vm2, %v4170_v29  ;;  %v4778_v2 = vld [vmem:[#allocation18_spill] sm:$0xff] }
  0xa1   : > { %3183 = vmatprep.mubr.msk.f32.mxu1 %vm355_vm2, %v3988_v13  ;;  %3299 = vmatprep.mubr.msk.f32.mxu0 %vm355_vm2, %v1903_v39  ;;  %v4780_v13 = vld [vmem:[#allocation20_spill] sm:$0xff] }
  0xa3   : > { %3184 = vmatmul.mubr.msk.f32.gmra.mrb[2].mxu1 %vm355_vm2, %v3994_v17  ;;  %v4781_v17 = vld [vmem:[#allocation21_spill] sm:$0xff] }
  0xa4   : > { %3300 = vmatmul.mubr.msk.f32.gmra.mrb[10].mxu0 %vm355_vm2, %v1905_v7  ;;  %3186 = vmatprep.mubr.msk.f32.mxu1 %vm355_vm2, %v3997_v18  ;;  %v4782_v18 = vld [vmem:[#allocation22_spill] sm:$0xff] }
  0xa5   : > { %3302 = vmatprep.mubr.msk.f32.mxu0 %vm355_vm2, %v4187_v42 }
  0xa7   : > { %3187 = vmatmul.mubr.msk.f32.gmra.mrb[4].mxu1 %vm355_vm2, %v4003_v22 }
  0xa8   : > { %3303 = vmatmul.mubr.msk.f32.gmra.mrb[12].mxu0 %vm355_vm2, %v4198_v47  ;;  %3189 = vmatprep.mubr.msk.f32.mxu1 %vm355_vm2, %v4011_v27 }
  0xa9   : > { %3305 = vmatprep.mubr.msk.f32.mxu0 %vm355_vm2, %v4201_v48 }
  0xab   : > { %3190 = vmatmul.mubr.msk.f32.gmra.mrb[6].mxu1 %vm355_vm2, %v4018_v30 }
  0xac   : > { %3306 = vmatmul.mubr.msk.f32.gmra.mrb[14].mxu0 %vm355_vm2, %v4207_v31  ;;  %3192 = vmatprep.mubr.msk.f32.mxu1 %vm355_vm2, %v4044_v37 }
  0xad   : > { %3310 = vmatprep.mubr.msk.f32.mxu0 %vm355_vm2, %v4109_v57 }
  0xaf   : > { %3193 = vmatmul.mubr.msk.f32.gmra.mrb[8].mxu1 %vm355_vm2, %v4055_v38 }
  0xb0   : > { %3311 = vmatmul.mubr.msk.f32.vlgmr.msra.gmra.mrb[0].mxu0 %vm355_vm2, %v4177_v33  ;;  %3195 = vmatprep.mubr.msk.f32.mxu1 %vm355_vm2, %v4064_v41 }
  0xb1   : > { %3313 = vmatprep.mubr.msk.f32.mxu0 %vm355_vm2, %v4240_v1 }
  0xb3   : > { %3196 = vmatmul.mubr.msk.f32.gmra.mrb[10].mxu1 %vm355_vm2, %v4087_v51 }
  0xb4   : > { %3314 = vmatmul.mubr.msk.f32.gmra.mrb[2].mxu0 %vm355_vm2, %v4250_v63  ;;  %3198 = vmatprep.mubr.msk.f32.mxu1 %vm355_vm2, %v4098_v54 }
  0xb5   : > { %3316 = vmatprep.mubr.msk.f32.mxu0 %vm355_vm2, %v4265_v62 }
  0xb7   : > { %3199 = vmatmul.mubr.msk.f32.gmra.mrb[12].mxu1 %vm355_vm2, %v4113_v59 }
  0xb8   : > { %3317 = vmatmul.mubr.msk.f32.gmra.mrb[4].mxu0 %vm355_vm2, %v4269_v14  ;;  %3201 = vmatprep.mubr.msk.f32.mxu1 %vm355_vm2, %v4289_v58 }
  0xb9   : > { %3319 = vmatprep.mubr.msk.f32.mxu0 %vm355_vm2, %v4282_v20 }
  0xbb   : > { %3202 = vmatmul.mubr.msk.f32.gmra.mrb[14].mxu1 %vm355_vm2, %v4130_v0 }
  0xbc   : > { %3320 = vmatmul.mubr.msk.f32.gmra.mrb[6].mxu0 %vm355_vm2, %v4285_v45  ;;  %3218 = vmatprep.mubr.msk.f32.mxu1 %vm355_vm2, %v4106_v56 }
  0xbd   : > { %3322 = vmatprep.mubr.msk.f32.mxu0 %vm355_vm2, %v4310_v26 }
  0xbf   : > { %3219 = vmatmul.mubr.msk.f32.vlgmr.msra.gmra.mrb[8].mxu1 %vm355_vm2, %v4122_v60 }
  0xc0   : > { %3323 = vmatmul.mubr.msk.f32.gmra.mrb[8].mxu0 %vm355_vm2, %v4315_v9  ;;  %3221 = vmatprep.mubr.msk.f32.mxu1 %vm355_vm2, %v4233_v21 }
  0xc1   : > { %3325 = vmatprep.mubr.msk.f32.mxu0 %vm355_vm2, %v4330_v11 }
  0xc3   : > { %3222 = vmatmul.mubr.msk.f32.gmra.mrb[10].mxu1 %vm355_vm2, %v4243_v15 }
  0xc4   : > { %3326 = vmatmul.mubr.msk.f32.gmra.mrb[10].mxu0 %vm355_vm2, %v4335_v61  ;;  %3224 = vmatprep.mubr.msk.f32.mxu1 %vm355_vm2, %v4170_v29 }
  0xc5   : > { %3328 = vmatprep.mubr.msk.f32.mxu0 %vm355_vm2, %v4778_v2 }
  0xc7   : > { %3225 = vmatmul.mubr.msk.f32.gmra.mrb[12].mxu1 %vm355_vm2, %v1903_v39 }
  0xc8   : > { %3329 = vmatmul.mubr.msk.f32.gmra.mrb[12].mxu0 %vm355_vm2, %v4779_v10  ;;  %3227 = vmatprep.mubr.msk.f32.mxu1 %vm355_vm2, %v1905_v7 }
  0xc9   : > { %3331 = vmatprep.mubr.msk.f32.mxu0 %vm355_vm2, %v4780_v13 }
  0xcb   : > { %3228 = vmatmul.mubr.msk.f32.gmra.mrb[14].mxu1 %vm355_vm2, %v4781_v17 }
  0xcc   : > { %3332 = vmatmul.mubr.msk.f32.gmra.mrb[14].mxu0 %vm355_vm2, %v4782_v18 }
  0xce   : > { %v2386_v41 = vpop.permute.xlu1 %2385 }
  0xd1   : > { %v2376_v30 = vpop.permute.xlu0 %2375 }
  0xd2   : > { %v2391_v52 = vpop.permute.xlu1 %2390 }
  0xd5   : > { %v2381_v51 = vpop.permute.xlu0 %2380 }
  0xd6   : > { %v2401_v57 = vpop.permute.xlu1 %2400 }
  0xd9   : > { %v2396_v55 = vpop.permute.xlu0 %2395 }
  0xda   : > { %v2411_v31 = vpop.permute.xlu1 %2410 }
  0xdd   : > { %v2406_v23 = vpop.permute.xlu0 %2405 }
  0xde   : > { %v2421_v36 = vpop.permute.xlu1 %2420 }
  0xe1   : > { %v2416_v49 = vpop.permute.xlu0 %2415 }
  0xe5   : > { %v2426_v10 = vpop.permute.xlu0 %2425 }
 0x172   : > { %v3182_v22 = vpop.f32.mrb[0].mxu1 }
 0x173   : > { %v1087_v27 = vpop.f32.mrb[1].mxu1 }
 0x176   : > { %v3185_v37 = vpop.f32.mrb[2].mxu1 }
 0x177   : > { %v1097_v38 = vpop.f32.mrb[3].mxu1 }
 0x17a   : > { %v3188_v43 = vpop.f32.mrb[4].mxu1 }
 0x17b   : > { %v1107_v50 = vpop.f32.mrb[5].mxu1 }
 0x17e   : > { %v3191_v53 = vpop.f32.mrb[6].mxu1 }
 0x17f   : > { %v1117_v54 = vpop.f32.mrb[7].mxu1 }
 0x183   : > { %v3312_v56 = vpop.f32.mrb[0].mxu0 }
 0x184   : > { %v3336_v59 = vadd.f32 %v3312_v56, %v3182_v22  ;;  %v2246_v60 = vpop.f32.mrb[1].mxu0 }
 0x185   : > { %v3337_v0 = vadd.f32 %v2246_v60, %v1087_v27 }
 0x186   : > { %2342 = vst [vmem:[%s3935_s18 + $0x8] sm:$0xff] %v3336_v59  ;;  %v2454_v3 = vmul.f32 %v3336_v59, %v2381_v51 }
 0x187   : > { %2341 = vst [vmem:[%s3935_s18] sm:$0xff] %v3337_v0  ;;  %v2453_v4 = vmul.f32 %v3337_v0, %v2376_v30  ;;  %v3315_v16 = vpop.f32.mrb[2].mxu0 }
 0x188   : > { %v2495_v29 = vmul.f32 %v2454_v3, %v2454_v3  ;;  %v3338_v33 = vadd.f32 %v3315_v16, %v3185_v37  ;;  %v2256_v42 = vpop.f32.mrb[3].mxu0  ;;  %v2431_v37 = vpop.permute.xlu1 %2430 }
 0x189   : > { %v2470_v46 = vadd.f32 %v2454_v3, %v2453_v4  ;;  %v2494_v47 = vmul.f32 %v2453_v4, %v2453_v4  ;;  %v3339_v48 = vadd.f32 %v2256_v42, %v1097_v38  ;;  %v2436_v3 = vpop.permute.xlu0 %2435 }
 0x18a   : > { %2344 = vst [vmem:[%s3935_s18 + $0x18] sm:$0xff] %v3338_v33  ;;  %v2456_v1 = vmul.f32 %v3338_v33, %v2391_v52 }
 0x18b   : > { %v2510_v21 = vadd.f32 %v2495_v29, %v2494_v47  ;;  %2343 = vst [vmem:[%s3935_s18 + $0x10] sm:$0xff] %v3339_v48  ;;  %v2455_v15 = vmul.f32 %v3339_v48, %v2386_v41  ;;  %v3318_v63 = vpop.f32.mrb[4].mxu0 }
 0x18c   : > { %v3340_v62 = vadd.f32 %v3318_v63, %v3188_v43  ;;  %v2266_v14 = vpop.f32.mrb[5].mxu0  ;;  %v2497_v9 = vmul.f32 %v2456_v1, %v2456_v1  ;;  %v2441_v48 = vpop.permute.xlu1 %2440 }
 0x18d   : > { %v2471_v20 = vadd.f32 %v2470_v46, %v2455_v15  ;;  %v2496_v45 = vmul.f32 %v2455_v15, %v2455_v15  ;;  %v3341_v58 = vadd.f32 %v2266_v14, %v1107_v50 }
 0x18e   : > { %2346 = vst [vmem:[%s3935_s18 + $0x28] sm:$0xff] %v3340_v62  ;;  %v2458_v26 = vmul.f32 %v3340_v62, %v2401_v57 }
 0x18f   : > { %v2511_v11 = vadd.f32 %v2510_v21, %v2496_v45  ;;  %2345 = vst [vmem:[%s3935_s18 + $0x20] sm:$0xff] %v3341_v58  ;;  %v2457_v61 = vmul.f32 %v3341_v58, %v2396_v55  ;;  %v2472_v8 = vadd.f32 %v2471_v20, %v2456_v1  ;;  %v3321_v34 = vpop.f32.mrb[6].mxu0 }
 0x190   : > { %v3342_v28 = vadd.f32 %v3321_v34, %v3191_v53  ;;  %v2276_v25 = vpop.f32.mrb[7].mxu0  ;;  %v2499_v5 = vmul.f32 %v2458_v26, %v2458_v26 }
 0x191   : > { %v2473_v24 = vadd.f32 %v2472_v8, %v2457_v61  ;;  %v2498_v44 = vmul.f32 %v2457_v61, %v2457_v61  ;;  %v2512_v19 = vadd.f32 %v2511_v11, %v2497_v9  ;;  %v3343_v40 = vadd.f32 %v2276_v25, %v1117_v54 }
 0x192   : > { %2348 = vst [vmem:[%s3935_s18 + $0x38] sm:$0xff] %v3342_v28  ;;  %v3220_v6 = vpop.f32.mrb[8].mxu1  ;;  %v2460_v32 = vmul.f32 %v3342_v28, %v2411_v31 }
 0x193   : > { %v2513_v12 = vadd.f32 %v2512_v19, %v2498_v44  ;;  %2347 = vst [vmem:[%s3935_s18 + $0x30] sm:$0xff] %v3343_v40  ;;  %v2459_v35 = vmul.f32 %v3343_v40, %v2406_v23  ;;  %v2474_v39 = vadd.f32 %v2473_v24, %v2458_v26  ;;  %v3324_v7 = vpop.f32.mrb[8].mxu0  ;;  %v1359_v2 = vpop.f32.mrb[9].mxu1 }
 0x194   : > { %v3344_v13 = vadd.f32 %v3324_v7, %v3220_v6  ;;  %v2286_v17 = vpop.f32.mrb[9].mxu0  ;;  %v2501_v43 = vmul.f32 %v2460_v32, %v2460_v32  ;;  %v2446_v24 = vpop.permute.xlu0 %2445 }
 0x195   : > { %v2475_v18 = vadd.f32 %v2474_v39, %v2459_v35  ;;  %v2500_v22 = vmul.f32 %v2459_v35, %v2459_v35  ;;  %v2514_v27 = vadd.f32 %v2513_v12, %v2499_v5  ;;  %v3345_v30 = vadd.f32 %v2286_v17, %v1359_v2  ;;  %v2451_v44 = vpop.permute.xlu1 %2450 }
 0x196   : > { %2350 = vst [vmem:[%s3935_s18 + $0x48] sm:$0xff] %v3344_v13  ;;  %v2462_v38 = vmul.f32 %v3344_v13, %v2421_v36  ;;  %v3223_v41 = vpop.f32.mrb[10].mxu1 }
 0x197   : > { %v2515_v50 = vadd.f32 %v2514_v27, %v2500_v22  ;;  %2349 = vst [vmem:[%s3935_s18 + $0x40] sm:$0xff] %v3345_v30  ;;  %v2461_v51 = vmul.f32 %v3345_v30, %v2416_v49  ;;  %v2476_v52 = vadd.f32 %v2475_v18, %v2460_v32  ;;  %v3327_v53 = vpop.f32.mrb[10].mxu0  ;;  %v1369_v54 = vpop.f32.mrb[11].mxu1 }
 0x198   : > { %v3346_v55 = vadd.f32 %v3327_v53, %v3223_v41  ;;  %v2296_v56 = vpop.f32.mrb[11].mxu0  ;;  %v2503_v4 = vmul.f32 %v2462_v38, %v2462_v38 }
 0x199   : > { %v2477_v57 = vadd.f32 %v2476_v52, %v2461_v51  ;;  %v2502_v59 = vmul.f32 %v2461_v51, %v2461_v51  ;;  %v2516_v60 = vadd.f32 %v2515_v50, %v2501_v43  ;;  %v3347_v0 = vadd.f32 %v2296_v56, %v1369_v54 }
 0x19a   : > { %2352 = vst [vmem:[%s3935_s18 + $0x58] sm:$0xff] %v3346_v55  ;;  %v3226_v16 = vpop.f32.mrb[12].mxu1  ;;  %v2464_v29 = vmul.f32 %v3346_v55, %v2431_v37 }
 0x19b   : > { %v2517_v23 = vadd.f32 %v2516_v60, %v2502_v59  ;;  %2351 = vst [vmem:[%s3935_s18 + $0x50] sm:$0xff] %v3347_v0  ;;  %v2463_v33 = vmul.f32 %v3347_v0, %v2426_v10  ;;  %v2478_v42 = vadd.f32 %v2477_v57, %v2462_v38  ;;  %v3330_v46 = vpop.f32.mrb[12].mxu0  ;;  %v1379_v47 = vpop.f32.mrb[13].mxu1 }
 0x19c   : > { %v3348_v31 = vadd.f32 %v3330_v46, %v3226_v16  ;;  %v2306_v21 = vpop.f32.mrb[13].mxu0  ;;  %v2505_v45 = vmul.f32 %v2464_v29, %v2464_v29 }
 0x19d   : > { %v2479_v1 = vadd.f32 %v2478_v42, %v2463_v33  ;;  %v2504_v15 = vmul.f32 %v2463_v33, %v2463_v33  ;;  %v2518_v63 = vadd.f32 %v2517_v23, %v2503_v4  ;;  %v3349_v62 = vadd.f32 %v2306_v21, %v1379_v47 }
 0x19e   : > { %2354 = vst [vmem:[%s3935_s18 + $0x68] sm:$0xff] %v3348_v31  ;;  %v2466_v14 = vmul.f32 %v3348_v31, %v2441_v48  ;;  %v3229_v20 = vpop.f32.mrb[14].mxu1 }
 0x19f   : > { %v2519_v58 = vadd.f32 %v2518_v63, %v2504_v15  ;;  %2353 = vst [vmem:[%s3935_s18 + $0x60] sm:$0xff] %v3349_v62  ;;  %v2465_v49 = vmul.f32 %v3349_v62, %v2436_v3  ;;  %v2480_v26 = vadd.f32 %v2479_v1, %v2464_v29  ;;  %v3333_v9 = vpop.f32.mrb[14].mxu0  ;;  %v1389_v11 = vpop.f32.mrb[15].mxu1 }
 0x1a0   : > { %v3350_v61 = vadd.f32 %v3333_v9, %v3229_v20  ;;  %v2316_v8 = vpop.f32.mrb[15].mxu0  ;;  %v2507_v19 = vmul.f32 %v2466_v14, %v2466_v14 }
 0x1a1   : > { %v2481_v34 = vadd.f32 %v2480_v26, %v2465_v49  ;;  %v2506_v36 = vmul.f32 %v2465_v49, %v2465_v49  ;;  %v2520_v28 = vadd.f32 %v2519_v58, %v2505_v45  ;;  %v3351_v25 = vadd.f32 %v2316_v8, %v1389_v11 }
 0x1a2   : > { %2356 = vst [vmem:[%s3935_s18 + $0x78] sm:$0xff] %v3350_v61  ;;  %v2468_v5 = vmul.f32 %v3350_v61, %v2451_v44 }
 0x1a3   : > { %v2521_v40 = vadd.f32 %v2520_v28, %v2506_v36  ;;  %2355 = vst [vmem:[%s3935_s18 + $0x70] sm:$0xff] %v3351_v25  ;;  %v2467_v6 = vmul.f32 %v3351_v25, %v2446_v24  ;;  %v2482_v12 = vadd.f32 %v2481_v34, %v2466_v14 }
 0x1a4   : > { %3590 = shalt.err (!%p3587_p4)
}
 0x1a5   : > { %s3591_s18 = scalar_lea.hbm %s4591_s27, 2048  ;;  %s3595_s15 = scalar_lea.hbm %s4739_s3, 12288 }
 0x1a6   : > { %p3592_p2 = scmp.ne.s32.totalorder %s4591_s27, %s3591_s18  ;;  %p3596_p8 = scmp.lt.u32.totalorder %s4591_s27, %s4739_s3 }
 0x1a7   : > { %p3597_p9 = scmp.lt.u32.totalorder %s3595_s15, %s3591_s18  ;;  %p3599_p11 = scmp.lt.u32.totalorder %s3591_s18, %s4591_s27 }
 0x1a8   : > { %p3593_p5 = pnand %p3592_p2, %p3869_p3 }
 0x1a9   : > { %p3598_p10 = por %p3597_p9, %p3596_p8 }
 0x1aa   : > { %p3594_p6 = pneg %p3593_p5 }
 0x1ab   : > { %p3600_p0 = por %p3599_p11, %p3598_p10 }
 0x1ad   : > { %p3601_p1 = pnand %p3600_p0, %p3594_p6 }
 0x1af   : > { %3604 = shalt.err (!%p3601_p1)
}
 0x1b0   : > { %s3760_s26 = smov 128   ;;  %s3761_s7 = smov 8   ;;  %v2483_v32 = vadd.f32 %v2482_v12, %v2467_v6  ;;  %v2508_v35 = vmul.f32 %v2467_v6, %v2467_v6  ;;  %v2522_v39 = vadd.f32 %v2521_v40, %v2507_v19  ;;  %v2509_v7 = vmul.f32 %v2468_v5, %v2468_v5  ;;  %v2469_v50 = vld [vmem:[%s3937_s20] sm:$0x1] }
 0x1b1   : > { %3466 = dma.vmem_to_hbm [thread:$0]  (%p3869_p3), %s4593_s16, 2048, %s4591_s27, %s4599_s23, %s3760_s26, %s3760_s26, %s3761_s7  }
 0x1b2   : > { %v2484_v2 = vadd.f32 %v2483_v32, %v2468_v5  ;;  %v2523_v10 = vadd.f32 %v2522_v39, %v2508_v35  ;;  %s4784_s11 = sadd.s32 4294967295, %s3755_s28   ;;  %s2943_s27 = sshll.u32 %s3743_s25, 4  ;;  %v2493_v53 = vld [vmem:[%s3939_s19] sm:$0x1] }
 0x1b3   : > { %s4625_s16 = sand.u32 1, %s4784_s11   ;;  %s2573_s23 = sshll.u32 %s3937_s20, 4  ;;  %s4637_s23 = int_to_ptr.vmem [resolvable:$true] %s2573_s23 }
 0x1b4   : > { %v2485_v13 = vrot.slane %v2484_v2, 4  ;;  %v2524_v17 = vadd.f32 %v2523_v10, %v2509_v7  ;;  %s2586_s29 = sshll.u32 %s3939_s19, 4  ;;  %s4635_s8 = scalar_lea.hbm %s4740_s4, %s2943_s27  ;;  %s4645_s29 = int_to_ptr.vmem [resolvable:$true] %s2586_s29 }
 0x1b5   : > { %s4643_s13 = scalar_lea.hbm %s4741_s5, %s2943_s27  ;;  %s2539_s30 = scalar_lea.sflag [#allocation5], %s4625_s16 }
 0x1b6   : > { %v2486_v18 = vadd.f32 %v2485_v13, %v2484_v2  ;;  %v2525_v22 = vrot.slane %v2524_v17, 4  ;;  %s3605_s15 = scalar_lea.vmem %s4637_s23, 16  ;;  %s3762_s10 = smov [#allocation4]  }
 0x1b7   : > { %p3606_p3 = scmp.ne.s32.totalorder %s4637_s23, %s3605_s15  ;;  %s3609_s24 = sshll.u32 %s3762_s10, 4  ;;  %s3610_s24 = int_to_ptr.vmem [resolvable:$false] %s3609_s24 }
 0x1b8   : > { %v2487_v27 = vrot.slane %v2486_v18, 2  ;;  %v2526_v30 = vadd.f32 %v2525_v22, %v2524_v17  ;;  %s3611_s26 = scalar_lea.vmem %s3610_s24, 32  ;;  %p3612_p5 = scmp.lt.s32.totalorder %s4637_s23, %s3610_s24 }
 0x1b9   : > { %p3607_p4 = pnand %p3606_p3, %p3898_p12  ;;  %p3613_p6 = scmp.lt.s32.totalorder %s3611_s26, %s3605_s15 }
 0x1ba   : > { %v2527_v37 = vrot.slane %v2526_v30, 2  ;;  %v2488_v38 = vadd.f32 %v2487_v27, %v2486_v18 }
 0x1bb   : > { %p3608_p2 = pneg %p3607_p4  ;;  %p3614_p8 = por %p3613_p6, %p3612_p5 }
 0x1bc   : > { %v2489_v41 = vrot.slane %v2488_v38, 1  ;;  %v2528_v43 = vadd.f32 %v2527_v37, %v2526_v30 }
 0x1bd   : > { %p3615_p9 = pnand %p3614_p8, %p3608_p2 }
 0x1be   : > { %v2490_v51 = vadd.f32 %v2489_v41, %v2488_v38  ;;  %v2529_v52 = vrot.slane %v2528_v43, 1 }
 0x1c0   : > { %v2491_v54 = vadd.f32 %v2490_v51, %v2469_v50  ;;  %v2530_v55 = vadd.f32 %v2529_v52, %v2528_v43 }
 0x1c2   : > { %2492 = vst [vmem:[%s3937_s20] sm:$0x1] %v2491_v54  ;;  %v2531_v56 = vadd.f32 %v2530_v55, %v2493_v53 }
 0x1c3   : > { %3618 = shalt.err (!%p3615_p9)
}
 0x1c4   : > { %s3619_s20 = scalar_lea.hbm %s4635_s8, 16  ;;  %s3623_s27 = scalar_lea.hbm %s4740_s4, 32 }
 0x1c5   : > { %p3620_p10 = scmp.ne.s32.totalorder %s4635_s8, %s3619_s20  ;;  %p3624_p1 = scmp.lt.u32.totalorder %s4635_s8, %s4740_s4 }
 0x1c6   : > { %p3625_p3 = scmp.lt.u32.totalorder %s3623_s27, %s3619_s20  ;;  %p3627_p2 = scmp.lt.u32.totalorder %s3619_s20, %s4635_s8 }
 0x1c7   : > { %p3621_p11 = pnand %p3620_p10, %p3898_p12 }
 0x1c8   : > { %p3626_p4 = por %p3625_p3, %p3624_p1 }
 0x1c9   : > { %p3622_p0 = pneg %p3621_p11 }
 0x1ca   : > { %p3628_p5 = por %p3627_p2, %p3626_p4 }
 0x1cc   : > { %p3629_p6 = pnand %p3628_p5, %p3622_p0 }
 0x1ce   : > { %3632 = shalt.err (!%p3629_p6)
}
 0x1cf   : > { %3467 = dma.vmem_to_hbm [thread:$0]  (%p3898_p12), %s4637_s23, 16, %s4635_s8, %s2539_s30   ;;  %2532 = vst [vmem:[%s3939_s19] sm:$0x1] %v2531_v56 }
 0x1d0   : > { %s3633_s25 = scalar_lea.vmem %s4645_s29, 16  ;;  %s3763_s18 = smov [#allocation6]  }
 0x1d1   : > { %p3634_p8 = scmp.ne.s32.totalorder %s4645_s29, %s3633_s25  ;;  %s3637_s15 = sshll.u32 %s3763_s18, 4  ;;  %s3638_s15 = int_to_ptr.vmem [resolvable:$false] %s3637_s15 }
 0x1d2   : > { %s3639_s10 = scalar_lea.vmem %s3638_s15, 32  ;;  %p3640_p11 = scmp.lt.s32.totalorder %s4645_s29, %s3638_s15 }
 0x1d3   : > { %p3635_p9 = pnand %p3634_p8, %p3898_p12  ;;  %p3641_p0 = scmp.lt.s32.totalorder %s3639_s10, %s3633_s25 }
 0x1d5   : > { %p3636_p10 = pneg %p3635_p9  ;;  %p3642_p1 = por %p3641_p0, %p3640_p11 }
 0x1d7   : > { %p3643_p3 = pnand %p3642_p1, %p3636_p10 }
 0x1d9   : > { %3646 = shalt.err (!%p3643_p3)
}
 0x1da   : > { %s3647_s19 = scalar_lea.hbm %s4643_s13, 16  ;;  %s3651_s24 = scalar_lea.hbm %s4741_s5, 32 }
 0x1db   : > { %p3648_p4 = scmp.ne.s32.totalorder %s4643_s13, %s3647_s19  ;;  %p3652_p6 = scmp.lt.u32.totalorder %s4643_s13, %s4741_s5 }
 0x1dc   : > { %p3653_p8 = scmp.lt.u32.totalorder %s3651_s24, %s3647_s19  ;;  %p3655_p10 = scmp.lt.u32.totalorder %s3647_s19, %s4643_s13 }
 0x1dd   : > { %p3649_p2 = pnand %p3648_p4, %p3898_p12 }
 0x1de   : > { %p3654_p9 = por %p3653_p8, %p3652_p6 }
 0x1df   : > { %p3650_p5 = pneg %p3649_p2 }
 0x1e0   : > { %p3656_p11 = por %p3655_p10, %p3654_p9 }
 0x1e2   : > { %p3657_p0 = pnand %p3656_p11, %p3650_p5 }
 0x1e4   : > { %3660 = shalt.err (!%p3657_p0)
}
 0x1e5   : > { %3468 = dma.vmem_to_hbm [thread:$0]  (%p3898_p12), %s4645_s29, 16, %s4643_s13, %s2539_s30  }
 0x1e6 PF: > { %p3482_p1 = scmp.ge.s32.totalorder %s3755_s28, 2  ;;  %s2598_s7 = sand.u32 1, %s3727_s21  }
 0x1e7   : > { %s2599_s11 = scalar_lea.sflag [#allocation3], %s2598_s7 }
 0x1e8   : > { %p3473_p3 = pnand %p3482_p1, %p3886_p7 }
 0x1ea   : > { %3706 = dma.done.wait (!%p3473_p3), %s2599_s11, 2048  }
 0x1eb   : > { %3708 = vsyncadd (!%p3473_p3), %s2599_s11, 4294965248  ;;  %s4785_s27 = sadd.s32 4294967294, %s3755_s28   ;;  %p3476_p4 = pnand %p3482_p1, %p3910_p13 }
 0x1ec   : > { %s2607_s17 = sand.u32 1, %s4785_s27  }
 0x1ed   : > { %s2608_s16 = scalar_lea.sflag [#allocation5], %s2607_s17 }
 0x1ee   : > { %3710 = dma.done.wait (!%p3476_p4), %s2608_s16, 32  }
 0x1ef   : > { %3712 = vsyncadd (!%p3476_p4), %s2608_s16, 4294967264  ;;  %s22_s28 = sadd.s32 1, %s3755_s28   ;;  %s4786_s18 = sld [smem:[#allocation9_spill]] }
 0x1f0   : > { %p19_p12 = scmp.ge.s32.totalorder %s22_s28, 8   ;;  %s4787_s19 = sld [smem:[#allocation10_spill]] }
 0x1f1   : > { %s4788_s20 = sld [smem:[#allocation16_spill]]  ;;  %s4789_s14 = sld [smem:[#allocation11_spill]] }
 0x1f2   : > { %s4790_s23 = sld [smem:[#allocation17_spill]]  ;;  %s4791_s24 = sld [smem:[#allocation12_spill]] }
 0x1f3   : > { %s4792_s25 = sld [smem:[#allocation13_spill]]  ;;  %s4793_s26 = sld [smem:[#allocation14_spill]] }
 0x1f4   : > { %s4794_s27 = sld [smem:[#allocation15_spill]]  ;;  %s4795_s21 = smov %s3731_s22 }
 0x1f5   :  { %21 = sbr.rel (!%p19_p12) target bundleno = 9 (0x9), region = 117 }
 0x1f7   : > { %s4796_s22 = smov %s4789_s14 }
 0x1fc   :  { %2620 = vsyncpa [#allocation3], 1 }
 0x1fd   :  { %2622 = vsyncpa [#allocation3 + $0x1], 1 }
 0x1fe   :  { %2623 = vsyncpa [#allocation5], 1 }
 0x1ff   :  { %2625 = vsyncpa [#allocation5 + $0x1], 1 }

</bundles_post_ra>
